<compile_context>
chip_gen: v7x
topology: tpu7x:2x2x1
jax: 0.10.0
libtpu: 0.0.40
codegen_flags: <defaults>
</compile_context>

<pallas_src>
import functools

import numpy as np

import jax
import jax.numpy as jnp
from jax.experimental import pallas as pl
from jax.experimental.pallas import tpu as pltpu


def _round_up(x, m):
    return (x + m - 1) // m * m


def _pick_tile(dim, cap=512):
    """Largest tile <= cap that divides dim (dim is a multiple of 128)."""
    for t in (cap, cap // 2, cap // 4, 128):
        if t <= dim and dim % t == 0:
            return t
    return dim


def _vmem_limit_bytes():
    """Generation-conditional scoped-VMEM budget (≈3/4 of physical, capped)."""
    cap = 64 * 1024 * 1024
    try:
        info = pltpu.get_tpu_info()
        cap = int(getattr(info, "vmem_capacity_bytes", cap))
    except Exception:
        pass
    cap = max(cap, 32 * 1024 * 1024)
    return int(min(cap * 3 // 4, 100 * 1024 * 1024))


_VMEM_LIMIT = _vmem_limit_bytes()


# ----------------------------------------------------------------------------
# Tiled matmul + bias (+ optional fused ReLU) Pallas kernel
# ----------------------------------------------------------------------------
def _matmul_bias_kernel(a_ref, b_ref, bias_ref, o_ref, *scratch, relu):
    # f32 output: accumulate directly into the resident output block.
    # bf16 output: accumulate into an f32 VMEM scratch, cast on final store.
    acc_ref = scratch[0] if scratch else o_ref
    k = pl.program_id(2)

    @pl.when(k == 0)
    def _():
        acc_ref[...] = jnp.zeros_like(acc_ref)

    acc_ref[...] += jnp.dot(a_ref[...], b_ref[...],
                            preferred_element_type=jnp.float32)

    @pl.when(k == pl.num_programs(2) - 1)
    def _():
        out = acc_ref[...] + bias_ref[...]
        if relu:
            out = jnp.maximum(out, 0.0)
        o_ref[...] = out.astype(o_ref.dtype)


def pallas_matmul_bias(a, b_p, bias_p, *, relu=False, out_dtype=jnp.float32):
    """out = a @ b_p + bias_p (row-broadcast), optional fused ReLU.

    a:      (M, K) any float (cast to bf16, zero-padded to (Mp, Kp)).
    b_p:    (Kp, Np) bf16, pre-packed (zero-padded, already transposed).
    bias_p: (1, Np) f32, pre-packed.
    Returns (M, Np) of out_dtype — caller slices valid columns.
    """
    M, K = a.shape
    Kp, Np = b_p.shape
    assert K <= Kp

    tm = min(512, _round_up(M, 8))
    Mp = _round_up(M, tm)
    tn = _pick_tile(Np)
    tk = _pick_tile(Kp)

    if (Mp, Kp) == (M, K) and a.dtype == jnp.bfloat16:
        a_p = a                              # already padded & cast (decoder path)
    else:
        a_p = jnp.zeros((Mp, Kp), jnp.bfloat16).at[:M, :K].set(
            a.astype(jnp.bfloat16))

    acc_in_out = out_dtype == jnp.float32
    scratch = [] if acc_in_out else [pltpu.VMEM((tm, tn), jnp.float32)]

    out = pl.pallas_call(
        functools.partial(_matmul_bias_kernel, relu=relu),
        out_shape=jax.ShapeDtypeStruct((Mp, Np), out_dtype),
        grid=(Mp // tm, Np // tn, Kp // tk),
        in_specs=[
            pl.BlockSpec((tm, tk), lambda i, j, k: (i, k)),
            pl.BlockSpec((tk, tn), lambda i, j, k: (k, j)),
            pl.BlockSpec((1, tn), lambda i, j, k: (0, j)),
        ],
        out_specs=pl.BlockSpec((tm, tn), lambda i, j, k: (i, j)),
        scratch_shapes=scratch,
        compiler_params=pltpu.CompilerParams(
            # k (reduction into the resident output block) stays last & arbitrary.
            dimension_semantics=("parallel", "parallel", "arbitrary"),
            vmem_limit_bytes=_VMEM_LIMIT,
        ),
    )(a_p, b_p, bias_p)
    return out[:M]


# ----------------------------------------------------------------------------
# LSTM layer recurrence kernel: only h_prev @ W_hh is inside the time loop;
# gates_ih = x @ W_ih + (b_ih + b_hh) is precomputed for all steps outside.
# ----------------------------------------------------------------------------
def _lstm_layer_kernel(gih_ref, w_hh_ref, h_out_ref, h_sc, c_sc, *, hp):
    t = pl.program_id(1)

    @pl.when(t == 0)
    def _():
        h_sc[...] = jnp.zeros_like(h_sc)
        c_sc[...] = jnp.zeros_like(c_sc)

    # (Bb, 4P) f32; PyTorch gate order [i, f, g, o], each gate in a
    # 128-lane-aligned slot of width hp (padded lanes are exactly 0).
    gates = gih_ref[0] + jnp.dot(h_sc[...].astype(jnp.bfloat16), w_hh_ref[...],
                                 preferred_element_type=jnp.float32)
    i_g = jax.nn.sigmoid(gates[:, 0 * hp:1 * hp])
    f_g = jax.nn.sigmoid(gates[:, 1 * hp:2 * hp])
    g_g = jnp.tanh(gates[:, 2 * hp:3 * hp])
    o_g = jax.nn.sigmoid(gates[:, 3 * hp:4 * hp])
    c_new = f_g * c_sc[...] + i_g * g_g        # padded lanes stay exactly 0
    h_new = o_g * jnp.tanh(c_new)
    c_sc[...] = c_new
    h_sc[...] = h_new
    h_out_ref[0] = h_new.astype(h_out_ref.dtype)


def pallas_lstm_layer(gih, w_hh_p, *, block_b):
    """gih: (T1, Bp, 4P) f32 precomputed input gates (+bias).
       w_hh_p: (P, 4P) bf16.  Returns hidden sequence (T1, Bp, P) bf16."""
    T1, Bp, g4 = gih.shape
    P = g4 // 4
    nb = Bp // block_b
    return pl.pallas_call(
        functools.partial(_lstm_layer_kernel, hp=P),
        out_shape=jax.ShapeDtypeStruct((T1, Bp, P), jnp.bfloat16),
        grid=(nb, T1),
        in_specs=[
            pl.BlockSpec((1, block_b, 4 * P), lambda b, t: (t, b, 0)),  # streamed / step
            pl.BlockSpec((P, 4 * P), lambda b, t: (0, 0)),              # resident W_hh
        ],
        out_specs=pl.BlockSpec((1, block_b, P), lambda b, t: (t, b, 0)),
        scratch_shapes=[
            pltpu.VMEM((block_b, P), jnp.float32),   # h state (per batch block)
            pltpu.VMEM((block_b, P), jnp.float32),   # c state (per batch block)
        ],
        compiler_params=pltpu.CompilerParams(
            # batch blocks are independent -> parallel (megacore on v7x);
            # time is the recurrence -> arbitrary, last.
            dimension_semantics=("parallel", "arbitrary"),
            vmem_limit_bytes=_VMEM_LIMIT,
        ),
    )(gih, w_hh_p)


# ----------------------------------------------------------------------------
# One-time host-side weight repacking (bf16 cast, lane/sublane padding,
# gate-slot packing) — hoisted out of the jitted per-call path.
# ----------------------------------------------------------------------------
def pack_params(params):
    conv_w = np.asarray(params["conv_w"], np.float32)       # (cmid, cin, 3, 3)
    cmid = conv_w.shape[0]
    kdim = conv_w.shape[1] * conv_w.shape[2] * conv_w.shape[3]
    E = int(params["fc_w"].shape[0])
    H = int(params["lstm"][0]["w_hh"].shape[1])
    V = int(params["lin_w"].shape[0])
    P = max(_round_up(E, 128), _round_up(H, 128))            # shared feature pad
    Vp = _round_up(V, 128)

    def pad2(mat, rows, cols):
        out = np.zeros((rows, cols), np.float32)
        out[:mat.shape[0], :mat.shape[1]] = mat
        return out

    def pad_bias(vec, cols):
        out = np.zeros((1, cols), np.float32)
        out[0, :vec.shape[0]] = vec
        return out

    packed = {
        "conv_w": jnp.asarray(pad2(conv_w.reshape(cmid, -1).T,
                                   _round_up(kdim, 128), _round_up(cmid, 128)),
                              jnp.bfloat16),
        "conv_b": jnp.asarray(pad_bias(np.asarray(params["conv_b"], np.float32),
                                       _round_up(cmid, 128))),
        "fc_w": jnp.asarray(pad2(np.asarray(params["fc_w"], np.float32).T,
                                 _round_up(cmid, 128), _round_up(E, 128)),
                            jnp.bfloat16),
        "fc_b": jnp.asarray(pad_bias(np.asarray(params["fc_b"], np.float32),
                                     _round_up(E, 128))),
        "embed": params["embed"],
        "lin_w": jnp.asarray(pad2(np.asarray(params["lin_w"], np.float32).T, P, Vp),
                             jnp.bfloat16),
        "lin_b": jnp.asarray(pad_bias(np.asarray(params["lin_b"], np.float32), Vp)),
        "lstm_w_ih": [],
        "lstm_w_hh": [],
        "lstm_b": [],
    }

    # Gate g of layer l lands in lane slot [g*P, g*P+H) -> in-kernel gate
    # slices are 128-lane aligned; padded bias/weight lanes are exactly zero.
    for layer in params["lstm"]:
        w_ih = np.asarray(layer["w_ih"], np.float32)          # (4H, in_sz)
        w_hh = np.asarray(layer["w_hh"], np.float32)          # (4H, H)
        bias = (np.asarray(layer["b_ih"], np.float32)
                + np.asarray(layer["b_hh"], np.float32))      # (4H,)
        in_sz = w_ih.shape[1]
        wi = np.zeros((P, 4 * P), np.float32)
        wh = np.zeros((P, 4 * P), np.float32)
        bb = np.zeros((1, 4 * P), np.float32)
        for g in range(4):
            wi[:in_sz, g * P:g * P + H] = w_ih[g * H:(g + 1) * H, :].T
            wh[:H, g * P:g * P + H] = w_hh[g * H:(g + 1) * H, :].T
            bb[0, g * P:g * P + H] = bias[g * H:(g + 1) * H]
        packed["lstm_w_ih"].append(jnp.asarray(wi, jnp.bfloat16))
        packed["lstm_w_hh"].append(jnp.asarray(wh, jnp.bfloat16))
        packed["lstm_b"].append(jnp.asarray(bb))

    meta = {"E": E, "H": H, "V": V, "P": P, "cmid": int(cmid)}
    return packed, meta


# ----------------------------------------------------------------------------
# Model glue (plain JAX: im2col, embedding gather, reshapes)
# ----------------------------------------------------------------------------
def _im2col(x_nchw, kh, kw):
    B, C, Hh, Ww = x_nchw.shape
    oh, ow = Hh - kh + 1, Ww - kw + 1
    cols = []
    for i in range(kh):
        for j in range(kw):
            cols.append(x_nchw[:, :, i:i + oh, j:j + ow])     # (B, C, oh, ow)
    patches = jnp.stack(cols, axis=2)                         # (B, C, 9, oh, ow)
    patches = patches.transpose(0, 3, 4, 1, 2).reshape(B * oh * ow, C * kh * kw)
    return patches, oh, ow


def encoder_cnn_forward(pk, images, meta):
    """Stand-in EncoderCNN: conv3x3 -> ReLU -> GAP -> fc -> ReLU (dropout=identity)."""
    B = images.shape[0]
    patches, oh, ow = _im2col(images, 3, 3)                   # (B*oh*ow, Cin*9)
    # Largest intermediate: emit bf16 (f32 accumulation in-kernel), GAP in f32.
    conv = pallas_matmul_bias(patches, pk["conv_w"], pk["conv_b"],
                              relu=True, out_dtype=jnp.bfloat16)
    cmid = meta["cmid"]
    feat = conv[:, :cmid].reshape(B, oh * ow, cmid).mean(axis=1, dtype=jnp.float32)
    features = pallas_matmul_bias(feat, pk["fc_w"], pk["fc_b"], relu=True)
    return features[:, :meta["E"]]                            # dropout: identity


def decoder_rnn_forward(pk, features, captions, meta):
    """DecoderRNN.forward: embed -> cat(features, embeddings) -> LSTM -> linear."""
    E, H, V, P = meta["E"], meta["H"], meta["V"], meta["P"]
    embeddings = pk["embed"][captions]                                # (T, B, E)
    x = jnp.concatenate([features[None, :, :], embeddings], axis=0)   # (T+1, B, E)
    T1, B, _ = x.shape

    block_b = min(32, _round_up(B, 8))        # batch block (megacore / vreg pressure)
    Bp = _round_up(B, block_b)

    seq = jnp.zeros((T1, Bp, P), jnp.bfloat16).at[:, :B, :E].set(
        x.astype(jnp.bfloat16))

    # Layer-major schedule: per layer, one big hoisted input-projection matmul
    # (M = T1*Bp) + a cheap sequential recurrence (only h @ W_hh per step).
    for w_ih_p, w_hh_p, bias_p in zip(pk["lstm_w_ih"], pk["lstm_w_hh"], pk["lstm_b"]):
        gih = pallas_matmul_bias(seq.reshape(T1 * Bp, P), w_ih_p, bias_p)
        gih = gih.reshape(T1, Bp, 4 * P)
        seq = pallas_lstm_layer(gih, w_hh_p, block_b=block_b)         # (T1, Bp, P) bf16

    # Vocab projection outside the recurrence: M = T1*Bp, tiled over Vp.
    logits = pallas_matmul_bias(seq.reshape(T1 * Bp, P), pk["lin_w"], pk["lin_b"])
    return logits.reshape(T1, Bp, -1)[:, :B, :V]


def cnn_to_rnn_forward(packed, images, captions, *, meta):
    features = encoder_cnn_forward(packed, images, meta)
    return decoder_rnn_forward(packed, features, captions, meta)


# ----------------------------------------------------------------------------
# Pure-JAX f32 reference (for a numerical sanity check)
# ----------------------------------------------------------------------------
def reference_forward(params, images, captions):
    B = images.shape[0]
    patches, oh, ow = _im2col(images, 3, 3)
    cmid = params["conv_w"].shape[0]
    w_mat = params["conv_w"].reshape(cmid, -1).T
    conv = jnp.maximum(patches @ w_mat + params["conv_b"], 0.0)
    feat = conv.reshape(B, oh * ow, cmid).mean(axis=1)
    features = jnp.maximum(feat @ params["fc_w"].T + params["fc_b"], 0.0)

    emb = params["embed"][captions]
    x = jnp.concatenate([features[None], emb], axis=0)
    H = params["lstm"][0]["w_hh"].shape[1]
    T1 = x.shape[0]
    h = [jnp.zeros((B, H), jnp.float32) for _ in params["lstm"]]
    c = [jnp.zeros((B, H), jnp.float32) for _ in params["lstm"]]
    outs = []
    for t in range(T1):
        inp = x[t]
        for l, layer in enumerate(params["lstm"]):
            gates = (inp @ layer["w_ih"].T + h[l] @ layer["w_hh"].T
                     + layer["b_ih"] + layer["b_hh"])
            i_g = jax.nn.sigmoid(gates[:, 0 * H:1 * H])
            f_g = jax.nn.sigmoid(gates[:, 1 * H:2 * H])
            g_g = jnp.tanh(gates[:, 2 * H:3 * H])
            o_g = jax.nn.sigmoid(gates[:, 3 * H:4 * H])
            c[l] = f_g * c[l] + i_g * g_g
            h[l] = o_g * jnp.tanh(c[l])
            inp = h[l]
        outs.append(inp @ params["lin_w"].T + params["lin_b"])
    return jnp.stack(outs, axis=0)


# ----------------------------------------------------------------------------
# Deterministic parameter init (PyTorch-like uniform ranges)
# ----------------------------------------------------------------------------
def init_params(key, *, cin, cmid, embed_size, hidden_size, vocab_size, num_layers):
    keys = jax.random.split(key, 16)

    def u(k, shape, fan_in):
        bound = 1.0 / jnp.sqrt(jnp.float32(fan_in))
        return jax.random.uniform(k, shape, jnp.float32, -bound, bound)

    params = {
        "conv_w": u(keys[0], (cmid, cin, 3, 3), cin * 9),
        "conv_b": u(keys[1], (cmid,), cin * 9),
        "fc_w": u(keys[2], (embed_size, cmid), cmid),
        "fc_b": u(keys[3], (embed_size,), cmid),
        "embed": jax.random.normal(keys[4], (vocab_size, embed_size), jnp.float32),
        "lin_w": u(keys[5], (vocab_size, hidden_size), hidden_size),
        "lin_b": u(keys[6], (vocab_size,), hidden_size),
        "lstm": [],
    }
    lkeys = jax.random.split(keys[7], num_layers * 4)
    for l in range(num_layers):
        in_sz = embed_size if l == 0 else hidden_size
        params["lstm"].append({
            "w_ih": u(lkeys[4 * l + 0], (4 * hidden_size, in_sz), hidden_size),
            "w_hh": u(lkeys[4 * l + 1], (4 * hidden_size, hidden_size), hidden_size),
            "b_ih": u(lkeys[4 * l + 2], (4 * hidden_size,), hidden_size),
            "b_hh": u(lkeys[4 * l + 3], (4 * hidden_size,), hidden_size),
        })
    return params


# ----------------------------------------------------------------------------
if __name__ == "__main__":
    embed_size, hidden_size, vocab_size, num_layers = 32, 32, 64, 2
    B, Cin, Cmid, Himg, Wimg, T = 2, 3, 16, 16, 16, 8

    key = jax.random.PRNGKey(0)
    k_img, k_cap, k_par = jax.random.split(key, 3)

    images = jax.random.normal(k_img, (B, Cin, Himg, Wimg), jnp.float32)    # NCHW
    captions = jax.random.randint(k_cap, (T, B), 0, vocab_size, jnp.int32)  # (seq, batch)

    params = init_params(
        k_par, cin=Cin, cmid=Cmid, embed_size=embed_size,
        hidden_size=hidden_size, vocab_size=vocab_size, num_layers=num_layers,
    )
    packed, meta = pack_params(params)   # one-time repack/cast, outside jit

    fwd = jax.jit(functools.partial(cnn_to_rnn_forward, meta=meta))
    outputs = jax.block_until_ready(fwd(packed, images, captions))
    assert outputs.shape == (T + 1, B, vocab_size), outputs.shape
    assert outputs.dtype == jnp.float32

    # Numerical sanity check vs. pure-JAX f32 reference (bf16 MXU tolerance).
    ref = jax.block_until_ready(reference_forward(params, images, captions))
    max_err = float(jnp.max(jnp.abs(outputs - ref)))
    assert bool(jnp.all(jnp.isfinite(outputs)))
    assert max_err < 1e-1, f"max abs err {max_err}"

    print("KERNEL_OK")
</pallas_src>

<mosaic_0001>
module attributes {stable_mosaic.version = 11 : i64} {
  func.func @_matmul_bias_kernel(%arg0: i32, %arg1: i32, %arg2: i32, %arg3: memref<392x128xbf16, #tpu.memory_space<vmem>>, %arg4: memref<128x128xbf16, #tpu.memory_space<vmem>>, %arg5: memref<1x128xf32, #tpu.memory_space<vmem>>, %arg6: memref<392x128xbf16, #tpu.memory_space<vmem>>, %arg7: memref<392x128xf32, #tpu.memory_space<vmem>>) attributes {dimension_semantics = [#tpu.dimension_semantics<parallel>, #tpu.dimension_semantics<parallel>, #tpu.dimension_semantics<arbitrary>], iteration_bounds = array<i64: 1, 1, 1>, scalar_prefetch = 0 : i64, scratch_operands = 1 : i64, tpu.core_type = #tpu.core_type<tc>, window_params = [{transform_indices = @transform_0, window_bounds = array<i64: 392, 128>}, {transform_indices = @transform_1, window_bounds = array<i64: 128, 128>}, {transform_indices = @transform_2, window_bounds = array<i64: 1, 128>}, {transform_indices = @transform_3, window_bounds = array<i64: 392, 128>}]} {
    %c0_i32 = arith.constant 0 : i32
    %0 = arith.cmpi eq, %arg2, %c0_i32 : i32
    %1 = arith.extui %0 : i1 to i32
    %c0_i32_0 = arith.constant 0 : i32
    %2 = arith.cmpi ne, %1, %c0_i32_0 : i32
    scf.if %2 {
      %cst_10 = arith.constant 0.000000e+00 : f32
      %12 = vector.broadcast %cst_10 : f32 to vector<392x128xf32>
      %c0_11 = arith.constant 0 : index
      %c0_12 = arith.constant 0 : index
      %13 = vector.load %arg7[%c0_11, %c0_12] : memref<392x128xf32, #tpu.memory_space<vmem>>, vector<392x128xf32>
      tpu.vector_store %arg7[%c0_11, %c0_12], %12 {strides = array<i32>} : memref<392x128xf32, #tpu.memory_space<vmem>>, vector<392x128xf32>,
    } else {
    }
    %c0 = arith.constant 0 : index
    %c0_1 = arith.constant 0 : index
    %3 = vector.load %arg7[%c0, %c0_1] : memref<392x128xf32, #tpu.memory_space<vmem>>, vector<392x128xf32>
    %c0_2 = arith.constant 0 : index
    %c0_3 = arith.constant 0 : index
    %4 = vector.load %arg3[%c0_2, %c0_3] : memref<392x128xbf16, #tpu.memory_space<vmem>>, vector<392x128xbf16>
    %c0_4 = arith.constant 0 : index
    %c0_5 = arith.constant 0 : index
    %5 = vector.load %arg4[%c0_4, %c0_5] : memref<128x128xbf16, #tpu.memory_space<vmem>>, vector<128x128xbf16>
    %cst = arith.constant dense<0.000000e+00> : vector<392x128xf32>
    %6 = tpu.matmul %4, %5, %cst {dimension_numbers = #tpu.dot_dimension_numbers<[1], [0], [0], [1], [0, 0, 1, 1], [], []>} : vector<392x128xbf16>, vector<128x128xbf16>, vector<392x128xf32> -> vector<392x128xf32>
    %7 = arith.addf %3, %6 : vector<392x128xf32>
    %c0_6 = arith.constant 0 : index
    %c0_7 = arith.constant 0 : index
    %8 = vector.load %arg7[%c0_6, %c0_7] : memref<392x128xf32, #tpu.memory_space<vmem>>, vector<392x128xf32>
    tpu.vector_store %arg7[%c0_6, %c0_7], %7 {strides = array<i32>} : memref<392x128xf32, #tpu.memory_space<vmem>>, vector<392x128xf32>,
    %c0_i32_8 = arith.constant 0 : i32
    %9 = arith.cmpi eq, %arg2, %c0_i32_8 : i32
    %10 = arith.extui %9 : i1 to i32
    %c0_i32_9 = arith.constant 0 : i32
    %11 = arith.cmpi ne, %10, %c0_i32_9 : i32
    scf.if %11 {
      %c0_10 = arith.constant 0 : index
      %c0_11 = arith.constant 0 : index
      %12 = vector.load %arg7[%c0_10, %c0_11] : memref<392x128xf32, #tpu.memory_space<vmem>>, vector<392x128xf32>
      %c0_12 = arith.constant 0 : index
      %c0_13 = arith.constant 0 : index
      %13 = vector.load %arg5[%c0_12, %c0_13] : memref<1x128xf32, #tpu.memory_space<vmem>>, vector<1x128xf32>
      %14 = vector.broadcast %13 : vector<1x128xf32> to vector<392x128xf32>
      %15 = arith.addf %12, %14 : vector<392x128xf32>
      %cst_14 = arith.constant 0.000000e+00 : f32
      %16 = vector.broadcast %cst_14 : f32 to vector<392x128xf32>
      %17 = arith.maximumf %15, %16 : vector<392x128xf32>
      %18 = arith.truncf %17 : vector<392x128xf32> to vector<392x128xbf16>
      %c0_15 = arith.constant 0 : index
      %c0_16 = arith.constant 0 : index
      %19 = vector.load %arg6[%c0_15, %c0_16] : memref<392x128xbf16, #tpu.memory_space<vmem>>, vector<392x128xbf16>
      tpu.vector_store %arg6[%c0_15, %c0_16], %18 {strides = array<i32>} : memref<392x128xbf16, #tpu.memory_space<vmem>>, vector<392x128xbf16>,
    } else {
    }
    return
  }
  func.func @transform_0(%arg0: i32, %arg1: i32, %arg2: i32) -> (i32, i32) {
    %c0_i32 = arith.constant 0 : i32
    return %arg0, %arg2 : i32, i32
  }
  func.func @transform_1(%arg0: i32, %arg1: i32, %arg2: i32) -> (i32, i32) {
    %c0_i32 = arith.constant 0 : i32
    return %arg2, %arg1 : i32, i32
  }
  func.func @transform_2(%arg0: i32, %arg1: i32, %arg2: i32) -> (i32, i32) {
    %c0_i32 = arith.constant 0 : i32
    %c0_i32_0 = arith.constant 0 : i32
    return %c0_i32, %arg1 : i32, i32
  }
  func.func @transform_3(%arg0: i32, %arg1: i32, %arg2: i32) -> (i32, i32) {
    %c0_i32 = arith.constant 0 : i32
    return %arg0, %arg1 : i32, i32
  }
}

module attributes {stable_mosaic.version = 11 : i64} {
  func.func @_matmul_bias_kernel(%arg0: i32, %arg1: i32, %arg2: i32, %arg3: memref<8x128xbf16, #tpu.memory_space<vmem>>, %arg4: memref<128x128xbf16, #tpu.memory_space<vmem>>, %arg5: memref<1x128xf32, #tpu.memory_space<vmem>>, %arg6: memref<8x128xf32, #tpu.memory_space<vmem>>) attributes {dimension_semantics = [#tpu.dimension_semantics<parallel>, #tpu.dimension_semantics<parallel>, #tpu.dimension_semantics<arbitrary>], iteration_bounds = array<i64: 1, 1, 1>, scalar_prefetch = 0 : i64, scratch_operands = 0 : i64, tpu.core_type = #tpu.core_type<tc>, window_params = [{transform_indices = @transform_0, window_bounds = array<i64: 8, 128>}, {transform_indices = @transform_1, window_bounds = array<i64: 128, 128>}, {transform_indices = @transform_2, window_bounds = array<i64: 1, 128>}, {transform_indices = @transform_3, window_bounds = array<i64: 8, 128>}]} {
    %c0_i32 = arith.constant 0 : i32
    %0 = arith.cmpi eq, %arg2, %c0_i32 : i32
    %1 = arith.extui %0 : i1 to i32
    %c0_i32_0 = arith.constant 0 : i32
    %2 = arith.cmpi ne, %1, %c0_i32_0 : i32
    scf.if %2 {
      %cst_10 = arith.constant 0.000000e+00 : f32
      %12 = vector.broadcast %cst_10 : f32 to vector<8x128xf32>
      %c0_11 = arith.constant 0 : index
      %c0_12 = arith.constant 0 : index
      %13 = vector.load %arg6[%c0_11, %c0_12] : memref<8x128xf32, #tpu.memory_space<vmem>>, vector<8x128xf32>
      tpu.vector_store %arg6[%c0_11, %c0_12], %12 {strides = array<i32>} : memref<8x128xf32, #tpu.memory_space<vmem>>, vector<8x128xf32>,
    } else {
    }
    %c0 = arith.constant 0 : index
    %c0_1 = arith.constant 0 : index
    %3 = vector.load %arg6[%c0, %c0_1] : memref<8x128xf32, #tpu.memory_space<vmem>>, vector<8x128xf32>
    %c0_2 = arith.constant 0 : index
    %c0_3 = arith.constant 0 : index
    %4 = vector.load %arg3[%c0_2, %c0_3] : memref<8x128xbf16, #tpu.memory_space<vmem>>, vector<8x128xbf16>
    %c0_4 = arith.constant 0 : index
    %c0_5 = arith.constant 0 : index
    %5 = vector.load %arg4[%c0_4, %c0_5] : memref<128x128xbf16, #tpu.memory_space<vmem>>, vector<128x128xbf16>
    %cst = arith.constant dense<0.000000e+00> : vector<8x128xf32>
    %6 = tpu.matmul %4, %5, %cst {dimension_numbers = #tpu.dot_dimension_numbers<[1], [0], [0], [1], [0, 0, 1, 1], [], []>} : vector<8x128xbf16>, vector<128x128xbf16>, vector<8x128xf32> -> vector<8x128xf32>
    %7 = arith.addf %3, %6 : vector<8x128xf32>
    %c0_6 = arith.constant 0 : index
    %c0_7 = arith.constant 0 : index
    %8 = vector.load %arg6[%c0_6, %c0_7] : memref<8x128xf32, #tpu.memory_space<vmem>>, vector<8x128xf32>
    tpu.vector_store %arg6[%c0_6, %c0_7], %7 {strides = array<i32>} : memref<8x128xf32, #tpu.memory_space<vmem>>, vector<8x128xf32>,
    %c0_i32_8 = arith.constant 0 : i32
    %9 = arith.cmpi eq, %arg2, %c0_i32_8 : i32
    %10 = arith.extui %9 : i1 to i32
    %c0_i32_9 = arith.constant 0 : i32
    %11 = arith.cmpi ne, %10, %c0_i32_9 : i32
    scf.if %11 {
      %c0_10 = arith.constant 0 : index
      %c0_11 = arith.constant 0 : index
      %12 = vector.load %arg6[%c0_10, %c0_11] : memref<8x128xf32, #tpu.memory_space<vmem>>, vector<8x128xf32>
      %c0_12 = arith.constant 0 : index
      %c0_13 = arith.constant 0 : index
      %13 = vector.load %arg5[%c0_12, %c0_13] : memref<1x128xf32, #tpu.memory_space<vmem>>, vector<1x128xf32>
      %14 = vector.broadcast %13 : vector<1x128xf32> to vector<8x128xf32>
      %15 = arith.addf %12, %14 : vector<8x128xf32>
      %cst_14 = arith.constant 0.000000e+00 : f32
      %16 = vector.broadcast %cst_14 : f32 to vector<8x128xf32>
      %17 = arith.maximumf %15, %16 : vector<8x128xf32>
      %c0_15 = arith.constant 0 : index
      %c0_16 = arith.constant 0 : index
      %18 = vector.load %arg6[%c0_15, %c0_16] : memref<8x128xf32, #tpu.memory_space<vmem>>, vector<8x128xf32>
      tpu.vector_store %arg6[%c0_15, %c0_16], %17 {strides = array<i32>} : memref<8x128xf32, #tpu.memory_space<vmem>>, vector<8x128xf32>,
    } else {
    }
    return
  }
  func.func @transform_0(%arg0: i32, %arg1: i32, %arg2: i32) -> (i32, i32) {
    %c0_i32 = arith.constant 0 : i32
    return %arg0, %arg2 : i32, i32
  }
  func.func @transform_1(%arg0: i32, %arg1: i32, %arg2: i32) -> (i32, i32) {
    %c0_i32 = arith.constant 0 : i32
    return %arg2, %arg1 : i32, i32
  }
  func.func @transform_2(%arg0: i32, %arg1: i32, %arg2: i32) -> (i32, i32) {
    %c0_i32 = arith.constant 0 : i32
    %c0_i32_0 = arith.constant 0 : i32
    return %c0_i32, %arg1 : i32, i32
  }
  func.func @transform_3(%arg0: i32, %arg1: i32, %arg2: i32) -> (i32, i32) {
    %c0_i32 = arith.constant 0 : i32
    return %arg0, %arg1 : i32, i32
  }
}

module attributes {stable_mosaic.version = 11 : i64} {
  func.func @_matmul_bias_kernel(%arg0: i32, %arg1: i32, %arg2: i32, %arg3: memref<72x128xbf16, #tpu.memory_space<vmem>>, %arg4: memref<128x512xbf16, #tpu.memory_space<vmem>>, %arg5: memref<1x512xf32, #tpu.memory_space<vmem>>, %arg6: memref<72x512xf32, #tpu.memory_space<vmem>>) attributes {dimension_semantics = [#tpu.dimension_semantics<parallel>, #tpu.dimension_semantics<parallel>, #tpu.dimension_semantics<arbitrary>], iteration_bounds = array<i64: 1, 1, 1>, scalar_prefetch = 0 : i64, scratch_operands = 0 : i64, tpu.core_type = #tpu.core_type<tc>, window_params = [{transform_indices = @transform_0, window_bounds = array<i64: 72, 128>}, {transform_indices = @transform_1, window_bounds = array<i64: 128, 512>}, {transform_indices = @transform_2, window_bounds = array<i64: 1, 512>}, {transform_indices = @transform_3, window_bounds = array<i64: 72, 512>}]} {
    %c0_i32 = arith.constant 0 : i32
    %0 = arith.cmpi eq, %arg2, %c0_i32 : i32
    %1 = arith.extui %0 : i1 to i32
    %c0_i32_0 = arith.constant 0 : i32
    %2 = arith.cmpi ne, %1, %c0_i32_0 : i32
    scf.if %2 {
      %cst_10 = arith.constant 0.000000e+00 : f32
      %12 = vector.broadcast %cst_10 : f32 to vector<72x512xf32>
      %c0_11 = arith.constant 0 : index
      %c0_12 = arith.constant 0 : index
      %13 = vector.load %arg6[%c0_11, %c0_12] : memref<72x512xf32, #tpu.memory_space<vmem>>, vector<72x512xf32>
      tpu.vector_store %arg6[%c0_11, %c0_12], %12 {strides = array<i32>} : memref<72x512xf32, #tpu.memory_space<vmem>>, vector<72x512xf32>,
    } else {
    }
    %c0 = arith.constant 0 : index
    %c0_1 = arith.constant 0 : index
    %3 = vector.load %arg6[%c0, %c0_1] : memref<72x512xf32, #tpu.memory_space<vmem>>, vector<72x512xf32>
    %c0_2 = arith.constant 0 : index
    %c0_3 = arith.constant 0 : index
    %4 = vector.load %arg3[%c0_2, %c0_3] : memref<72x128xbf16, #tpu.memory_space<vmem>>, vector<72x128xbf16>
    %c0_4 = arith.constant 0 : index
    %c0_5 = arith.constant 0 : index
    %5 = vector.load %arg4[%c0_4, %c0_5] : memref<128x512xbf16, #tpu.memory_space<vmem>>, vector<128x512xbf16>
    %cst = arith.constant dense<0.000000e+00> : vector<72x512xf32>
    %6 = tpu.matmul %4, %5, %cst {dimension_numbers = #tpu.dot_dimension_numbers<[1], [0], [0], [1], [0, 0, 1, 1], [], []>} : vector<72x128xbf16>, vector<128x512xbf16>, vector<72x512xf32> -> vector<72x512xf32>
    %7 = arith.addf %3, %6 : vector<72x512xf32>
    %c0_6 = arith.constant 0 : index
    %c0_7 = arith.constant 0 : index
    %8 = vector.load %arg6[%c0_6, %c0_7] : memref<72x512xf32, #tpu.memory_space<vmem>>, vector<72x512xf32>
    tpu.vector_store %arg6[%c0_6, %c0_7], %7 {strides = array<i32>} : memref<72x512xf32, #tpu.memory_space<vmem>>, vector<72x512xf32>,
    %c0_i32_8 = arith.constant 0 : i32
    %9 = arith.cmpi eq, %arg2, %c0_i32_8 : i32
    %10 = arith.extui %9 : i1 to i32
    %c0_i32_9 = arith.constant 0 : i32
    %11 = arith.cmpi ne, %10, %c0_i32_9 : i32
    scf.if %11 {
      %c0_10 = arith.constant 0 : index
      %c0_11 = arith.constant 0 : index
      %12 = vector.load %arg6[%c0_10, %c0_11] : memref<72x512xf32, #tpu.memory_space<vmem>>, vector<72x512xf32>
      %c0_12 = arith.constant 0 : index
      %c0_13 = arith.constant 0 : index
      %13 = vector.load %arg5[%c0_12, %c0_13] : memref<1x512xf32, #tpu.memory_space<vmem>>, vector<1x512xf32>
      %14 = vector.broadcast %13 : vector<1x512xf32> to vector<72x512xf32>
      %15 = arith.addf %12, %14 : vector<72x512xf32>
      %c0_14 = arith.constant 0 : index
      %c0_15 = arith.constant 0 : index
      %16 = vector.load %arg6[%c0_14, %c0_15] : memref<72x512xf32, #tpu.memory_space<vmem>>, vector<72x512xf32>
      tpu.vector_store %arg6[%c0_14, %c0_15], %15 {strides = array<i32>} : memref<72x512xf32, #tpu.memory_space<vmem>>, vector<72x512xf32>,
    } else {
    }
    return
  }
  func.func @transform_0(%arg0: i32, %arg1: i32, %arg2: i32) -> (i32, i32) {
    %c0_i32 = arith.constant 0 : i32
    return %arg0, %arg2 : i32, i32
  }
  func.func @transform_1(%arg0: i32, %arg1: i32, %arg2: i32) -> (i32, i32) {
    %c0_i32 = arith.constant 0 : i32
    return %arg2, %arg1 : i32, i32
  }
  func.func @transform_2(%arg0: i32, %arg1: i32, %arg2: i32) -> (i32, i32) {
    %c0_i32 = arith.constant 0 : i32
    %c0_i32_0 = arith.constant 0 : i32
    return %c0_i32, %arg1 : i32, i32
  }
  func.func @transform_3(%arg0: i32, %arg1: i32, %arg2: i32) -> (i32, i32) {
    %c0_i32 = arith.constant 0 : i32
    return %arg0, %arg1 : i32, i32
  }
}

module attributes {stable_mosaic.version = 11 : i64} {
  func.func @_lstm_layer_kernel(%arg0: i32, %arg1: i32, %arg2: memref<1x8x512xf32, #tpu.memory_space<vmem>>, %arg3: memref<128x512xbf16, #tpu.memory_space<vmem>>, %arg4: memref<1x8x128xbf16, #tpu.memory_space<vmem>>, %arg5: memref<8x128xf32, #tpu.memory_space<vmem>>, %arg6: memref<8x128xf32, #tpu.memory_space<vmem>>) attributes {dimension_semantics = [#tpu.dimension_semantics<parallel>, #tpu.dimension_semantics<arbitrary>], iteration_bounds = array<i64: 1, 9>, scalar_prefetch = 0 : i64, scratch_operands = 2 : i64, tpu.core_type = #tpu.core_type<tc>, window_params = [{transform_indices = @transform_0, window_bounds = array<i64: 1, 8, 512>}, {pipeline_mode = #tpu.pipeline_mode<synchronous>, transform_indices = @transform_1, window_bounds = array<i64: 128, 512>}, {transform_indices = @transform_2, window_bounds = array<i64: 1, 8, 128>}]} {
    %c0_i32 = arith.constant 0 : i32
    %0 = arith.cmpi eq, %arg1, %c0_i32 : i32
    %1 = arith.extui %0 : i1 to i32
    %c0_i32_0 = arith.constant 0 : i32
    %2 = arith.cmpi ne, %1, %c0_i32_0 : i32
    scf.if %2 {
      %cst_19 = arith.constant 0.000000e+00 : f32
      %42 = vector.broadcast %cst_19 : f32 to vector<8x128xf32>
      %c0_20 = arith.constant 0 : index
      %c0_21 = arith.constant 0 : index
      %43 = vector.load %arg5[%c0_20, %c0_21] : memref<8x128xf32, #tpu.memory_space<vmem>>, vector<8x128xf32>
      tpu.vector_store %arg5[%c0_20, %c0_21], %42 {strides = array<i32>} : memref<8x128xf32, #tpu.memory_space<vmem>>, vector<8x128xf32>,
      %cst_22 = arith.constant 0.000000e+00 : f32
      %44 = vector.broadcast %cst_22 : f32 to vector<8x128xf32>
      %c0_23 = arith.constant 0 : index
      %c0_24 = arith.constant 0 : index
      %45 = vector.load %arg6[%c0_23, %c0_24] : memref<8x128xf32, #tpu.memory_space<vmem>>, vector<8x128xf32>
      tpu.vector_store %arg6[%c0_23, %c0_24], %44 {strides = array<i32>} : memref<8x128xf32, #tpu.memory_space<vmem>>, vector<8x128xf32>,
    } else {
    }
    %c0 = arith.constant 0 : index
    %c0_1 = arith.constant 0 : index
    %c0_2 = arith.constant 0 : index
    %3 = vector.load %arg2[%c0, %c0_1, %c0_2] : memref<1x8x512xf32, #tpu.memory_space<vmem>>, vector<1x8x512xf32>
    %4 = vector.shape_cast %3 : vector<1x8x512xf32> to vector<8x512xf32>
    %c0_3 = arith.constant 0 : index
    %c0_4 = arith.constant 0 : index
    %5 = vector.load %arg5[%c0_3, %c0_4] : memref<8x128xf32, #tpu.memory_space<vmem>>, vector<8x128xf32>
    %6 = arith.truncf %5 : vector<8x128xf32> to vector<8x128xbf16>
    %c0_5 = arith.constant 0 : index
    %c0_6 = arith.constant 0 : index
    %7 = vector.load %arg3[%c0_5, %c0_6] : memref<128x512xbf16, #tpu.memory_space<vmem>>, vector<128x512xbf16>
    %cst = arith.constant dense<0.000000e+00> : vector<8x512xf32>
    %8 = tpu.matmul %6, %7, %cst {dimension_numbers = #tpu.dot_dimension_numbers<[1], [0], [0], [1], [0, 0, 1, 1], [], []>} : vector<8x128xbf16>, vector<128x512xbf16>, vector<8x512xf32> -> vector<8x512xf32>
    %9 = arith.addf %4, %8 : vector<8x512xf32>
    %10 = vector.extract_strided_slice %9 {offsets = [0, 0], sizes = [8, 128], strides = [1, 1]} : vector<8x512xf32> to vector<8x128xf32>
    %11 = arith.negf %10 : vector<8x128xf32>
    %12 = math.exp %11 : vector<8x128xf32>
    %cst_7 = arith.constant 1.000000e+00 : f32
    %13 = vector.broadcast %cst_7 : f32 to vector<8x128xf32>
    %14 = arith.addf %13, %12 : vector<8x128xf32>
    %15 = arith.divf %13, %14 : vector<8x128xf32>
    %16 = vector.extract_strided_slice %9 {offsets = [0, 128], sizes = [8, 128], strides = [1, 1]} : vector<8x512xf32> to vector<8x128xf32>
    %17 = arith.negf %16 : vector<8x128xf32>
    %18 = math.exp %17 : vector<8x128xf32>
    %cst_8 = arith.constant 1.000000e+00 : f32
    %19 = vector.broadcast %cst_8 : f32 to vector<8x128xf32>
    %20 = arith.addf %19, %18 : vector<8x128xf32>
    %21 = arith.divf %19, %20 : vector<8x128xf32>
    %22 = vector.extract_strided_slice %9 {offsets = [0, 256], sizes = [8, 128], strides = [1, 1]} : vector<8x512xf32> to vector<8x128xf32>
    %23 = math.tanh %22 : vector<8x128xf32>
    %24 = vector.extract_strided_slice %9 {offsets = [0, 384], sizes = [8, 128], strides = [1, 1]} : vector<8x512xf32> to vector<8x128xf32>
    %25 = arith.negf %24 : vector<8x128xf32>
    %26 = math.exp %25 : vector<8x128xf32>
    %cst_9 = arith.constant 1.000000e+00 : f32
    %27 = vector.broadcast %cst_9 : f32 to vector<8x128xf32>
    %28 = arith.addf %27, %26 : vector<8x128xf32>
    %29 = arith.divf %27, %28 : vector<8x128xf32>
    %c0_10 = arith.constant 0 : index
    %c0_11 = arith.constant 0 : index
    %30 = vector.load %arg6[%c0_10, %c0_11] : memref<8x128xf32, #tpu.memory_space<vmem>>, vector<8x128xf32>
    %31 = arith.mulf %21, %30 : vector<8x128xf32>
    %32 = arith.mulf %15, %23 : vector<8x128xf32>
    %33 = arith.addf %31, %32 : vector<8x128xf32>
    %34 = math.tanh %33 : vector<8x128xf32>
    %35 = arith.mulf %29, %34 : vector<8x128xf32>
    %c0_12 = arith.constant 0 : index
    %c0_13 = arith.constant 0 : index
    %36 = vector.load %arg6[%c0_12, %c0_13] : memref<8x128xf32, #tpu.memory_space<vmem>>, vector<8x128xf32>
    tpu.vector_store %arg6[%c0_12, %c0_13], %33 {strides = array<i32>} : memref<8x128xf32, #tpu.memory_space<vmem>>, vector<8x128xf32>,
    %c0_14 = arith.constant 0 : index
    %c0_15 = arith.constant 0 : index
    %37 = vector.load %arg5[%c0_14, %c0_15] : memref<8x128xf32, #tpu.memory_space<vmem>>, vector<8x128xf32>
    tpu.vector_store %arg5[%c0_14, %c0_15], %35 {strides = array<i32>} : memref<8x128xf32, #tpu.memory_space<vmem>>, vector<8x128xf32>,
    %38 = arith.truncf %35 : vector<8x128xf32> to vector<8x128xbf16>
    %c0_16 = arith.constant 0 : index
    %c0_17 = arith.constant 0 : index
    %c0_18 = arith.constant 0 : index
    %39 = vector.load %arg4[%c0_16, %c0_17, %c0_18] : memref<1x8x128xbf16, #tpu.memory_space<vmem>>, vector<1x8x128xbf16>
    %40 = vector.shape_cast %39 : vector<1x8x128xbf16> to vector<8x128xbf16>
    %41 = vector.shape_cast %38 : vector<8x128xbf16> to vector<1x8x128xbf16>
    tpu.vector_store %arg4[%c0_16, %c0_17, %c0_18], %41 {strides = array<i32>} : memref<1x8x128xbf16, #tpu.memory_space<vmem>>, vector<1x8x128xbf16>,
    return
  }
  func.func @transform_0(%arg0: i32, %arg1: i32) -> (i32, i32, i32) {
    %c0_i32 = arith.constant 0 : i32
    %c0_i32_0 = arith.constant 0 : i32
    return %arg1, %arg0, %c0_i32 : i32, i32, i32
  }
  func.func @transform_1(%arg0: i32, %arg1: i32) -> (i32, i32) {
    %c0_i32 = arith.constant 0 : i32
    %c0_i32_0 = arith.constant 0 : i32
    %c0_i32_1 = arith.constant 0 : i32
    return %c0_i32, %c0_i32_0 : i32, i32
  }
  func.func @transform_2(%arg0: i32, %arg1: i32) -> (i32, i32, i32) {
    %c0_i32 = arith.constant 0 : i32
    %c0_i32_0 = arith.constant 0 : i32
    return %arg1, %arg0, %c0_i32 : i32, i32, i32
  }
}

module attributes {stable_mosaic.version = 11 : i64} {
  func.func @_matmul_bias_kernel(%arg0: i32, %arg1: i32, %arg2: i32, %arg3: memref<72x128xbf16, #tpu.memory_space<vmem>>, %arg4: memref<128x128xbf16, #tpu.memory_space<vmem>>, %arg5: memref<1x128xf32, #tpu.memory_space<vmem>>, %arg6: memref<72x128xf32, #tpu.memory_space<vmem>>) attributes {dimension_semantics = [#tpu.dimension_semantics<parallel>, #tpu.dimension_semantics<parallel>, #tpu.dimension_semantics<arbitrary>], iteration_bounds = array<i64: 1, 1, 1>, scalar_prefetch = 0 : i64, scratch_operands = 0 : i64, tpu.core_type = #tpu.core_type<tc>, window_params = [{transform_indices = @transform_0, window_bounds = array<i64: 72, 128>}, {transform_indices = @transform_1, window_bounds = array<i64: 128, 128>}, {transform_indices = @transform_2, window_bounds = array<i64: 1, 128>}, {transform_indices = @transform_3, window_bounds = array<i64: 72, 128>}]} {
    %c0_i32 = arith.constant 0 : i32
    %0 = arith.cmpi eq, %arg2, %c0_i32 : i32
    %1 = arith.extui %0 : i1 to i32
    %c0_i32_0 = arith.constant 0 : i32
    %2 = arith.cmpi ne, %1, %c0_i32_0 : i32
    scf.if %2 {
      %cst_10 = arith.constant 0.000000e+00 : f32
      %12 = vector.broadcast %cst_10 : f32 to vector<72x128xf32>
      %c0_11 = arith.constant 0 : index
      %c0_12 = arith.constant 0 : index
      %13 = vector.load %arg6[%c0_11, %c0_12] : memref<72x128xf32, #tpu.memory_space<vmem>>, vector<72x128xf32>
      tpu.vector_store %arg6[%c0_11, %c0_12], %12 {strides = array<i32>} : memref<72x128xf32, #tpu.memory_space<vmem>>, vector<72x128xf32>,
    } else {
    }
    %c0 = arith.constant 0 : index
    %c0_1 = arith.constant 0 : index
    %3 = vector.load %arg6[%c0, %c0_1] : memref<72x128xf32, #tpu.memory_space<vmem>>, vector<72x128xf32>
    %c0_2 = arith.constant 0 : index
    %c0_3 = arith.constant 0 : index
    %4 = vector.load %arg3[%c0_2, %c0_3] : memref<72x128xbf16, #tpu.memory_space<vmem>>, vector<72x128xbf16>
    %c0_4 = arith.constant 0 : index
    %c0_5 = arith.constant 0 : index
    %5 = vector.load %arg4[%c0_4, %c0_5] : memref<128x128xbf16, #tpu.memory_space<vmem>>, vector<128x128xbf16>
    %cst = arith.constant dense<0.000000e+00> : vector<72x128xf32>
    %6 = tpu.matmul %4, %5, %cst {dimension_numbers = #tpu.dot_dimension_numbers<[1], [0], [0], [1], [0, 0, 1, 1], [], []>} : vector<72x128xbf16>, vector<128x128xbf16>, vector<72x128xf32> -> vector<72x128xf32>
    %7 = arith.addf %3, %6 : vector<72x128xf32>
    %c0_6 = arith.constant 0 : index
    %c0_7 = arith.constant 0 : index
    %8 = vector.load %arg6[%c0_6, %c0_7] : memref<72x128xf32, #tpu.memory_space<vmem>>, vector<72x128xf32>
    tpu.vector_store %arg6[%c0_6, %c0_7], %7 {strides = array<i32>} : memref<72x128xf32, #tpu.memory_space<vmem>>, vector<72x128xf32>,
    %c0_i32_8 = arith.constant 0 : i32
    %9 = arith.cmpi eq, %arg2, %c0_i32_8 : i32
    %10 = arith.extui %9 : i1 to i32
    %c0_i32_9 = arith.constant 0 : i32
    %11 = arith.cmpi ne, %10, %c0_i32_9 : i32
    scf.if %11 {
      %c0_10 = arith.constant 0 : index
      %c0_11 = arith.constant 0 : index
      %12 = vector.load %arg6[%c0_10, %c0_11] : memref<72x128xf32, #tpu.memory_space<vmem>>, vector<72x128xf32>
      %c0_12 = arith.constant 0 : index
      %c0_13 = arith.constant 0 : index
      %13 = vector.load %arg5[%c0_12, %c0_13] : memref<1x128xf32, #tpu.memory_space<vmem>>, vector<1x128xf32>
      %14 = vector.broadcast %13 : vector<1x128xf32> to vector<72x128xf32>
      %15 = arith.addf %12, %14 : vector<72x128xf32>
      %c0_14 = arith.constant 0 : index
      %c0_15 = arith.constant 0 : index
      %16 = vector.load %arg6[%c0_14, %c0_15] : memref<72x128xf32, #tpu.memory_space<vmem>>, vector<72x128xf32>
      tpu.vector_store %arg6[%c0_14, %c0_15], %15 {strides = array<i32>} : memref<72x128xf32, #tpu.memory_space<vmem>>, vector<72x128xf32>,
    } else {
    }
    return
  }
  func.func @transform_0(%arg0: i32, %arg1: i32, %arg2: i32) -> (i32, i32) {
    %c0_i32 = arith.constant 0 : i32
    return %arg0, %arg2 : i32, i32
  }
  func.func @transform_1(%arg0: i32, %arg1: i32, %arg2: i32) -> (i32, i32) {
    %c0_i32 = arith.constant 0 : i32
    return %arg2, %arg1 : i32, i32
  }
  func.func @transform_2(%arg0: i32, %arg1: i32, %arg2: i32) -> (i32, i32) {
    %c0_i32 = arith.constant 0 : i32
    %c0_i32_0 = arith.constant 0 : i32
    return %c0_i32, %arg1 : i32, i32
  }
  func.func @transform_3(%arg0: i32, %arg1: i32, %arg2: i32) -> (i32, i32) {
    %c0_i32 = arith.constant 0 : i32
    return %arg0, %arg1 : i32, i32
  }
}

</mosaic_0001>

<bundles_post_ra>
// kernel: cnn_to_rnn_forward.8
= control target key start
LH: loop header
LB: loop body
LE: loop exit
PB: predicated region body
PF: predicated region fallthrough
CT: control target
= control target key end

     0   :  { %v194_v0 = vmov 0.0   ;;  %vm195_vm0 = vmmov 0   ;;  %s249_s1 = inlined_call_operand.vmem [shape: bf16[128,128], index: 1, kind: input, shape index: {}]   ;;  %s250_s0 = inlined_call_operand.vmem [shape: bf16[8,128], index: 0, kind: input, shape index: {}]   ;;  %s251_s2 = inlined_call_operand.vmem [shape: f32[1,128], index: 2, kind: input, shape index: {}]   ;;  %s252_s3 = inlined_call_operand.vmem [shape: f32[8,128], index: 3, kind: output, shape index: {}]  }
   0x1   :  { %164 = vmatprep.subr.bf16.mxu0 %v194_v0  ;;  %v186_v1 = vld [vmem:[%s249_s1] sm:$0xff]   ;;  %180 = vmatprep.mubr.msk.bf16.mxu0 %vm195_vm0, %v194_v0  ;;  %v187_v2 = vld [vmem:[%s249_s1 + $0x8] sm:$0xff]   ;;  %v188_v3 = vld [vmem:[%s249_s1 + $0x10] sm:$0xff]  }
   0x2   :  { %165 = vmatpush3.bf16.msra.mxu0 %v186_v1  ;;  %v189_v4 = vld [vmem:[%s249_s1 + $0x18] sm:$0xff]   ;;  %v190_v5 = vld [vmem:[%s249_s1 + $0x20] sm:$0xff]   ;;  %v191_v6 = vld [vmem:[%s249_s1 + $0x28] sm:$0xff]  }
   0x3   :  { %166 = vmatprep.subr.bf16.mxu0 %v194_v0  ;;  %v192_v7 = vld [vmem:[%s249_s1 + $0x30] sm:$0xff]   ;;  %v193_v8 = vld [vmem:[%s249_s1 + $0x38] sm:$0xff]   ;;  %v21_v9 = vld [vmem:[%s250_s0] sm:$0xf] }
   0x4   :  { %v154_v11 = vld [vmem:[%s251_s2] ss:$0 sm:$0xff] }
   0x6   :  { %167 = vmatpush3.bf16.msra.mxu0 %v187_v2 }
   0x7   :  { %168 = vmatprep.subr.bf16.mxu0 %v194_v0 }
   0xa   :  { %169 = vmatpush3.bf16.msra.mxu0 %v188_v3 }
   0xb   :  { %170 = vmatprep.subr.bf16.mxu0 %v194_v0 }
   0xe   :  { %171 = vmatpush3.bf16.msra.mxu0 %v189_v4 }
   0xf   :  { %172 = vmatprep.subr.bf16.mxu0 %v194_v0 }
  0x12   :  { %173 = vmatpush3.bf16.msra.mxu0 %v190_v5 }
  0x13   :  { %174 = vmatprep.subr.bf16.mxu0 %v194_v0 }
  0x16   :  { %175 = vmatpush3.bf16.msra.mxu0 %v191_v6 }
  0x17   :  { %176 = vmatprep.subr.bf16.mxu0 %v194_v0 }
  0x1a   :  { %177 = vmatpush3.bf16.msra.mxu0 %v192_v7 }
  0x1b   :  { %178 = vmatprep.subr.bf16.mxu0 %v194_v0 }
  0x1e   :  { %179 = vmatpush3.bf16.msra.mxu0 %v193_v8 }
  0x21   :  { %181 = vmatmul.mubr.bf16.vlgmr.msra.gmra.mrb[0].mxu0 %v21_v9 }
  0xf4   :  { %v120_v10 = vpop.f32.mrb[0].mxu0 }
  0xf5   :  { %v182_v12 = vpop.f32.mrb[1].mxu0  ;;  %v139_v14 = vadd.f32 %v154_v11, %v120_v10 }
  0xf6   :  { %v123_v13 = vpop.f32.mrb[2].mxu0 }
  0xf7   :  { %v183_v15 = vpop.f32.mrb[3].mxu0  ;;  %v140_v16 = vmax.f32 %v139_v14, 0.0 }
  0xf9   :  { %141 = vst [vmem:[%s252_s3] sm:$0xff] %v140_v16 }

// kernel: cnn_to_rnn_forward.7
= control target key start
LH: loop header
LB: loop body
LE: loop exit
PB: predicated region body
PF: predicated region fallthrough
CT: control target
= control target key end

     0   :  { %v1590_v0 = vmov 0.0   ;;  %vm1591_vm0 = vmmov 0   ;;  %s1906_s1 = inlined_call_operand.vmem [shape: bf16[128,128], index: 1, kind: input, shape index: {}]   ;;  %s1907_s0 = inlined_call_operand.vmem [shape: bf16[392,128], index: 0, kind: input, shape index: {}]   ;;  %s1908_s2 = inlined_call_operand.vmem [shape: f32[1,128], index: 2, kind: input, shape index: {}]   ;;  %s1909_s3 = inlined_call_operand.vmem [shape: bf16[392,128], index: 3, kind: output, shape index: {}]  }
   0x1   :  { %1423 = vmatprep.subr.bf16.mxu0 %v1590_v0  ;;  %v1557_v1 = vld [vmem:[%s1906_s1] sm:$0xff]   ;;  %1539 = vmatprep.subr.bf16.mxu1 %v1590_v0  ;;  %v1558_v2 = vld [vmem:[%s1906_s1 + $0x8] sm:$0xff]   ;;  %v1559_v3 = vld [vmem:[%s1906_s1 + $0x10] sm:$0xff]  }
   0x2   :  { %1439 = vmatprep.mubr.msk.bf16.mxu0 %vm1591_vm0, %v1590_v0  ;;  %1491 = vmatprep.mubr.msk.bf16.mxu1 %vm1591_vm0, %v1590_v0  ;;  %v1560_v4 = vld [vmem:[%s1906_s1 + $0x18] sm:$0xff]   ;;  %v1561_v5 = vld [vmem:[%s1906_s1 + $0x20] sm:$0xff]   ;;  %v1562_v6 = vld [vmem:[%s1906_s1 + $0x28] sm:$0xff]  }
   0x3   :  { %1424 = vmatpush3.bf16.msra.mxu0 %v1557_v1  ;;  %1547 = vmatpush3.bf16.msra.mxu1 %v1557_v1  ;;  %v1563_v7 = vld [vmem:[%s1906_s1 + $0x30] sm:$0xff]   ;;  %v1564_v8 = vld [vmem:[%s1906_s1 + $0x38] sm:$0xff]   ;;  %v1565_v9 = vld [vmem:[%s1907_s0] sm:$0xff]  }
   0x4   :  { %1425 = vmatprep.subr.bf16.mxu0 %v1590_v0  ;;  %1540 = vmatprep.subr.bf16.mxu1 %v1590_v0  ;;  %v1566_v10 = vld [vmem:[%s1907_s0 + $0x68] sm:$0xff]   ;;  %v1568_v12 = vld [vmem:[%s1907_s0 + $0x70] sm:$0xff]   ;;  %v1570_v14 = vld [vmem:[%s1907_s0 + $0x78] sm:$0xff]  }
   0x5   :  { %v1567_v11 = vld [vmem:[%s1907_s0 + $0x8] sm:$0xff]   ;;  %v1569_v13 = vld [vmem:[%s1907_s0 + $0x10] sm:$0xff]   ;;  %v1571_v15 = vld [vmem:[%s1907_s0 + $0x18] sm:$0xff]  }
   0x6   :  { %v1572_v16 = vld [vmem:[%s1907_s0 + $0x80] sm:$0xff]   ;;  %v1574_v18 = vld [vmem:[%s1907_s0 + $0x88] sm:$0xff]   ;;  %v1576_v20 = vld [vmem:[%s1907_s0 + $0x90] sm:$0xff]  }
   0x7   :  { %1426 = vmatpush3.bf16.msra.mxu0 %v1558_v2  ;;  %1548 = vmatpush3.bf16.msra.mxu1 %v1558_v2  ;;  %v1573_v17 = vld [vmem:[%s1907_s0 + $0x20] sm:$0xff]   ;;  %v1575_v19 = vld [vmem:[%s1907_s0 + $0x28] sm:$0xff]   ;;  %v1577_v21 = vld [vmem:[%s1907_s0 + $0x30] sm:$0xff]  }
   0x8   :  { %1427 = vmatprep.subr.bf16.mxu0 %v1590_v0  ;;  %1541 = vmatprep.subr.bf16.mxu1 %v1590_v0  ;;  %v1578_v22 = vld [vmem:[%s1907_s0 + $0x98] sm:$0xff]   ;;  %v1580_v24 = vld [vmem:[%s1907_s0 + $0xa0] sm:$0xff]   ;;  %v1582_v26 = vld [vmem:[%s1907_s0 + $0xa8] sm:$0xff]  }
   0x9   :  { %v1579_v23 = vld [vmem:[%s1907_s0 + $0x38] sm:$0xff]   ;;  %v1581_v25 = vld [vmem:[%s1907_s0 + $0x40] sm:$0xff]   ;;  %v1583_v27 = vld [vmem:[%s1907_s0 + $0x48] sm:$0xff]  }
   0xa   :  { %v1584_v28 = vld [vmem:[%s1907_s0 + $0xb0] sm:$0xff]   ;;  %v1586_v30 = vld [vmem:[%s1907_s0 + $0xb8] sm:$0xff]   ;;  %v1588_v32 = vld [vmem:[%s1907_s0 + $0xc0] ss:$0 sps:$4 sm:$0xff]  }
   0xb   :  { %1428 = vmatpush3.bf16.msra.mxu0 %v1559_v3  ;;  %1549 = vmatpush3.bf16.msra.mxu1 %v1559_v3  ;;  %v1585_v29 = vld [vmem:[%s1907_s0 + $0x50] sm:$0xff]   ;;  %v1587_v31 = vld [vmem:[%s1907_s0 + $0x58] sm:$0xff]   ;;  %v1589_v33 = vld [vmem:[%s1907_s0 + $0x60] sm:$0xff]  }
   0xc   :  { %1429 = vmatprep.subr.bf16.mxu0 %v1590_v0  ;;  %1542 = vmatprep.subr.bf16.mxu1 %v1590_v0  ;;  %v1780_v34 = vld [vmem:[%s1908_s2] ss:$0 sm:$0xff] }
   0xf   :  { %1430 = vmatpush3.bf16.msra.mxu0 %v1560_v4  ;;  %1550 = vmatpush3.bf16.msra.mxu1 %v1560_v4 }
  0x10   :  { %1431 = vmatprep.subr.bf16.mxu0 %v1590_v0  ;;  %1543 = vmatprep.subr.bf16.mxu1 %v1590_v0 }
  0x13   :  { %1432 = vmatpush3.bf16.msra.mxu0 %v1561_v5  ;;  %1551 = vmatpush3.bf16.msra.mxu1 %v1561_v5 }
  0x14   :  { %1433 = vmatprep.subr.bf16.mxu0 %v1590_v0  ;;  %1544 = vmatprep.subr.bf16.mxu1 %v1590_v0 }
  0x17   :  { %1434 = vmatpush3.bf16.msra.mxu0 %v1562_v6  ;;  %1552 = vmatpush3.bf16.msra.mxu1 %v1562_v6 }
  0x18   :  { %1435 = vmatprep.subr.bf16.mxu0 %v1590_v0  ;;  %1545 = vmatprep.subr.bf16.mxu1 %v1590_v0 }
  0x1b   :  { %1436 = vmatpush3.bf16.msra.mxu0 %v1563_v7  ;;  %1553 = vmatpush3.bf16.msra.mxu1 %v1563_v7 }
  0x1c   :  { %1437 = vmatprep.subr.bf16.mxu0 %v1590_v0  ;;  %1546 = vmatprep.subr.bf16.mxu1 %v1590_v0 }
  0x1f   :  { %1438 = vmatpush3.bf16.msra.mxu0 %v1564_v8  ;;  %1554 = vmatpush3.bf16.msra.mxu1 %v1564_v8 }
  0x22   :  { %1440 = vmatmul.mubr.bf16.vlgmr.msra.gmra.mrb[0].mxu0 %v1565_v9  ;;  %1492 = vmatmul.mubr.bf16.vlgmr.msra.gmra.mrb[0].mxu1 %v1566_v10 }
  0x23   :  { %1443 = vmatprep.mubr.msk.bf16.mxu0 %vm1591_vm0, %v1590_v0  ;;  %1495 = vmatprep.mubr.msk.bf16.mxu1 %vm1591_vm0, %v1590_v0 }
  0x2a   :  { %1444 = vmatmul.mubr.bf16.gmra.mrb[4].mxu0 %v1567_v11  ;;  %1496 = vmatmul.mubr.bf16.gmra.mrb[4].mxu1 %v1568_v12 }
  0x2b   :  { %1447 = vmatprep.mubr.msk.bf16.mxu0 %vm1591_vm0, %v1590_v0  ;;  %1499 = vmatprep.mubr.msk.bf16.mxu1 %vm1591_vm0, %v1590_v0 }
  0x32   :  { %1448 = vmatmul.mubr.bf16.gmra.mrb[8].mxu0 %v1569_v13  ;;  %1500 = vmatmul.mubr.bf16.gmra.mrb[8].mxu1 %v1570_v14 }
  0x33   :  { %1451 = vmatprep.mubr.msk.bf16.mxu0 %vm1591_vm0, %v1590_v0  ;;  %1503 = vmatprep.mubr.msk.bf16.mxu1 %vm1591_vm0, %v1590_v0 }
  0x3a   :  { %1452 = vmatmul.mubr.bf16.gmra.mrb[12].mxu0 %v1571_v15  ;;  %1504 = vmatmul.mubr.bf16.gmra.mrb[12].mxu1 %v1572_v16 }
  0x3b   :  { %1455 = vmatprep.mubr.msk.bf16.mxu0 %vm1591_vm0, %v1590_v0  ;;  %1507 = vmatprep.mubr.msk.bf16.mxu1 %vm1591_vm0, %v1590_v0 }
  0x42   :  { %1456 = vmatmul.mubr.bf16.gmra.mrb[16].mxu0 %v1573_v17  ;;  %1508 = vmatmul.mubr.bf16.gmra.mrb[16].mxu1 %v1574_v18 }
  0x43   :  { %1459 = vmatprep.mubr.msk.bf16.mxu0 %vm1591_vm0, %v1590_v0  ;;  %1511 = vmatprep.mubr.msk.bf16.mxu1 %vm1591_vm0, %v1590_v0 }
  0x4a   :  { %1460 = vmatmul.mubr.bf16.gmra.mrb[20].mxu0 %v1575_v19  ;;  %1512 = vmatmul.mubr.bf16.gmra.mrb[20].mxu1 %v1576_v20 }
  0x4b   :  { %1463 = vmatprep.mubr.msk.bf16.mxu0 %vm1591_vm0, %v1590_v0  ;;  %1515 = vmatprep.mubr.msk.bf16.mxu1 %vm1591_vm0, %v1590_v0 }
  0x52   :  { %1464 = vmatmul.mubr.bf16.gmra.mrb[24].mxu0 %v1577_v21  ;;  %1516 = vmatmul.mubr.bf16.gmra.mrb[24].mxu1 %v1578_v22 }
  0x53   :  { %1467 = vmatprep.mubr.msk.bf16.mxu0 %vm1591_vm0, %v1590_v0  ;;  %1519 = vmatprep.mubr.msk.bf16.mxu1 %vm1591_vm0, %v1590_v0 }
  0x5a   :  { %1468 = vmatmul.mubr.bf16.gmra.mrb[28].mxu0 %v1579_v23  ;;  %1520 = vmatmul.mubr.bf16.gmra.mrb[28].mxu1 %v1580_v24 }
  0x5b   :  { %1471 = vmatprep.mubr.msk.bf16.mxu0 %vm1591_vm0, %v1590_v0  ;;  %1523 = vmatprep.mubr.msk.bf16.mxu1 %vm1591_vm0, %v1590_v0 }
  0x62   :  { %1472 = vmatmul.mubr.bf16.gmra.mrb[32].mxu0 %v1581_v25  ;;  %1524 = vmatmul.mubr.bf16.gmra.mrb[32].mxu1 %v1582_v26 }
  0x63   :  { %1475 = vmatprep.mubr.msk.bf16.mxu0 %vm1591_vm0, %v1590_v0  ;;  %1527 = vmatprep.mubr.msk.bf16.mxu1 %vm1591_vm0, %v1590_v0 }
  0x6a   :  { %1476 = vmatmul.mubr.bf16.gmra.mrb[36].mxu0 %v1583_v27  ;;  %1528 = vmatmul.mubr.bf16.gmra.mrb[36].mxu1 %v1584_v28 }
  0x6b   :  { %1479 = vmatprep.mubr.msk.bf16.mxu0 %vm1591_vm0, %v1590_v0  ;;  %1531 = vmatprep.mubr.msk.bf16.mxu1 %vm1591_vm0, %v1590_v0 }
  0x72   :  { %1480 = vmatmul.mubr.bf16.gmra.mrb[40].mxu0 %v1585_v29  ;;  %1532 = vmatmul.mubr.bf16.gmra.mrb[40].mxu1 %v1586_v30 }
  0x73   :  { %1483 = vmatprep.mubr.msk.bf16.mxu0 %vm1591_vm0, %v1590_v0  ;;  %1535 = vmatprep.mubr.msk.bf16.mxu1 %vm1591_vm0, %v1590_v0 }
  0x7a   :  { %1484 = vmatmul.mubr.bf16.gmra.mrb[44].mxu0 %v1587_v31  ;;  %1536 = vmatmul.mubr.bf16.gmra.mrb[44].mxu1 %v1588_v32 }
  0x7b   :  { %1487 = vmatprep.mubr.msk.bf16.mxu0 %vm1591_vm0, %v1590_v0 }
  0x82   :  { %1488 = vmatmul.mubr.bf16.gmra.mrb[48].mxu0 %v1589_v33 }
  0xf5   :  { %v412_v35 = vpop.f32.mrb[0].mxu0  ;;  %v516_v36 = vpop.f32.mrb[0].mxu1 }
  0xf6   :  { %v767_v37 = vadd.f32 %v1780_v34, %v412_v35  ;;  %v1441_v38 = vpop.f32.mrb[1].mxu0  ;;  %v793_v39 = vadd.f32 %v1780_v34, %v516_v36  ;;  %v1493_v40 = vpop.f32.mrb[1].mxu1 }
  0xf7   :  { %v415_v41 = vpop.f32.mrb[2].mxu0  ;;  %v519_v42 = vpop.f32.mrb[2].mxu1 }
  0xf8   :  { %v768_v43 = vadd.f32 %v1780_v34, %v415_v41  ;;  %v1442_v44 = vpop.f32.mrb[3].mxu0  ;;  %v842_v45 = vmax.f32 %v793_v39, 0.0  ;;  %v794_v46 = vadd.f32 %v1780_v34, %v519_v42  ;;  %v1494_v47 = vpop.f32.mrb[3].mxu1  ;;  %v816_v48 = vmax.f32 %v767_v37, 0.0 }
  0xfa   :  { %v817_v49 = vmax.f32 %v768_v43, 0.0  ;;  %v843_v50 = vmax.f32 %v794_v46, 0.0 }
  0xfc   :  { %v1250_v51 = vpack.c.bf16 %v817_v49, %v816_v48  ;;  %v1315_v52 = vpack.c.bf16 %v843_v50, %v842_v45 }
  0xfd   :  { %v420_v53 = vpop.f32.mrb[4].mxu0  ;;  %v524_v54 = vpop.f32.mrb[4].mxu1 }
  0xfe   :  { %1251 = vst [vmem:[%s1909_s3] sm:$0xff] %v1250_v51   ;;  %v769_v55 = vadd.f32 %v1780_v34, %v420_v53  ;;  %v1445_v56 = vpop.f32.mrb[5].mxu0  ;;  %1379 = vst [vmem:[%s1909_s3 + $0x68] sm:$0xff] %v1315_v52   ;;  %v795_v57 = vadd.f32 %v1780_v34, %v524_v54  ;;  %v1497_v58 = vpop.f32.mrb[5].mxu1 }
  0xff   :  { %v423_v59 = vpop.f32.mrb[6].mxu0  ;;  %v527_v60 = vpop.f32.mrb[6].mxu1 }
 0x100   :  { %v770_v61 = vadd.f32 %v1780_v34, %v423_v59  ;;  %v1446_v62 = vpop.f32.mrb[7].mxu0  ;;  %v844_v63 = vmax.f32 %v795_v57, 0.0  ;;  %v796_v0 = vadd.f32 %v1780_v34, %v527_v60  ;;  %v1498_v1 = vpop.f32.mrb[7].mxu1  ;;  %v818_v2 = vmax.f32 %v769_v55, 0.0 }
 0x102   :  { %v819_v3 = vmax.f32 %v770_v61, 0.0  ;;  %v845_v4 = vmax.f32 %v796_v0, 0.0 }
 0x104   :  { %v1255_v5 = vpack.c.bf16 %v819_v3, %v818_v2  ;;  %v1320_v6 = vpack.c.bf16 %v845_v4, %v844_v63 }
 0x105   :  { %v428_v7 = vpop.f32.mrb[8].mxu0  ;;  %v532_v8 = vpop.f32.mrb[8].mxu1 }
 0x106   :  { %1367 = vst [vmem:[%s1909_s3 + $0x8] sm:$0xff] %v1255_v5   ;;  %v771_v9 = vadd.f32 %v1780_v34, %v428_v7  ;;  %v1449_v10 = vpop.f32.mrb[9].mxu0  ;;  %1380 = vst [vmem:[%s1909_s3 + $0x70] sm:$0xff] %v1320_v6   ;;  %v797_v11 = vadd.f32 %v1780_v34, %v532_v8  ;;  %v1501_v12 = vpop.f32.mrb[9].mxu1 }
 0x107   :  { %v431_v13 = vpop.f32.mrb[10].mxu0  ;;  %v535_v14 = vpop.f32.mrb[10].mxu1 }
 0x108   :  { %v772_v15 = vadd.f32 %v1780_v34, %v431_v13  ;;  %v1450_v16 = vpop.f32.mrb[11].mxu0  ;;  %v846_v17 = vmax.f32 %v797_v11, 0.0  ;;  %v798_v18 = vadd.f32 %v1780_v34, %v535_v14  ;;  %v1502_v19 = vpop.f32.mrb[11].mxu1  ;;  %v820_v20 = vmax.f32 %v771_v9, 0.0 }
 0x10a   :  { %v821_v21 = vmax.f32 %v772_v15, 0.0  ;;  %v847_v22 = vmax.f32 %v798_v18, 0.0 }
 0x10c   :  { %v1260_v23 = vpack.c.bf16 %v821_v21, %v820_v20  ;;  %v1325_v24 = vpack.c.bf16 %v847_v22, %v846_v17 }
 0x10d   :  { %v436_v25 = vpop.f32.mrb[12].mxu0  ;;  %v540_v26 = vpop.f32.mrb[12].mxu1 }
 0x10e   :  { %1368 = vst [vmem:[%s1909_s3 + $0x10] sm:$0xff] %v1260_v23   ;;  %v773_v27 = vadd.f32 %v1780_v34, %v436_v25  ;;  %v1453_v28 = vpop.f32.mrb[13].mxu0  ;;  %1381 = vst [vmem:[%s1909_s3 + $0x78] sm:$0xff] %v1325_v24   ;;  %v799_v29 = vadd.f32 %v1780_v34, %v540_v26  ;;  %v1505_v30 = vpop.f32.mrb[13].mxu1 }
 0x10f   :  { %v439_v31 = vpop.f32.mrb[14].mxu0  ;;  %v543_v32 = vpop.f32.mrb[14].mxu1 }
 0x110   :  { %v774_v33 = vadd.f32 %v1780_v34, %v439_v31  ;;  %v1454_v35 = vpop.f32.mrb[15].mxu0  ;;  %v848_v36 = vmax.f32 %v799_v29, 0.0  ;;  %v800_v37 = vadd.f32 %v1780_v34, %v543_v32  ;;  %v1506_v38 = vpop.f32.mrb[15].mxu1  ;;  %v822_v39 = vmax.f32 %v773_v27, 0.0 }
 0x112   :  { %v823_v40 = vmax.f32 %v774_v33, 0.0  ;;  %v849_v41 = vmax.f32 %v800_v37, 0.0 }
 0x114   :  { %v1265_v42 = vpack.c.bf16 %v823_v40, %v822_v39  ;;  %v1330_v43 = vpack.c.bf16 %v849_v41, %v848_v36 }
 0x115   :  { %v444_v44 = vpop.f32.mrb[16].mxu0  ;;  %v548_v45 = vpop.f32.mrb[16].mxu1 }
 0x116   :  { %1369 = vst [vmem:[%s1909_s3 + $0x18] sm:$0xff] %v1265_v42   ;;  %v775_v46 = vadd.f32 %v1780_v34, %v444_v44  ;;  %v1457_v47 = vpop.f32.mrb[17].mxu0  ;;  %1382 = vst [vmem:[%s1909_s3 + $0x80] sm:$0xff] %v1330_v43   ;;  %v801_v48 = vadd.f32 %v1780_v34, %v548_v45  ;;  %v1509_v49 = vpop.f32.mrb[17].mxu1 }
 0x117   :  { %v447_v50 = vpop.f32.mrb[18].mxu0  ;;  %v551_v51 = vpop.f32.mrb[18].mxu1 }
 0x118   :  { %v776_v52 = vadd.f32 %v1780_v34, %v447_v50  ;;  %v1458_v53 = vpop.f32.mrb[19].mxu0  ;;  %v850_v54 = vmax.f32 %v801_v48, 0.0  ;;  %v802_v55 = vadd.f32 %v1780_v34, %v551_v51  ;;  %v1510_v56 = vpop.f32.mrb[19].mxu1  ;;  %v824_v57 = vmax.f32 %v775_v46, 0.0 }
 0x11a   :  { %v825_v58 = vmax.f32 %v776_v52, 0.0  ;;  %v851_v59 = vmax.f32 %v802_v55, 0.0 }
 0x11c   :  { %v1270_v60 = vpack.c.bf16 %v825_v58, %v824_v57  ;;  %v1335_v61 = vpack.c.bf16 %v851_v59, %v850_v54 }
 0x11d   :  { %v452_v62 = vpop.f32.mrb[20].mxu0  ;;  %v556_v63 = vpop.f32.mrb[20].mxu1 }
 0x11e   :  { %1370 = vst [vmem:[%s1909_s3 + $0x20] sm:$0xff] %v1270_v60   ;;  %v777_v0 = vadd.f32 %v1780_v34, %v452_v62  ;;  %v1461_v1 = vpop.f32.mrb[21].mxu0  ;;  %1383 = vst [vmem:[%s1909_s3 + $0x88] sm:$0xff] %v1335_v61   ;;  %v803_v2 = vadd.f32 %v1780_v34, %v556_v63  ;;  %v1513_v3 = vpop.f32.mrb[21].mxu1 }
 0x11f   :  { %v455_v4 = vpop.f32.mrb[22].mxu0  ;;  %v559_v5 = vpop.f32.mrb[22].mxu1 }
 0x120   :  { %v778_v6 = vadd.f32 %v1780_v34, %v455_v4  ;;  %v1462_v7 = vpop.f32.mrb[23].mxu0  ;;  %v852_v8 = vmax.f32 %v803_v2, 0.0  ;;  %v804_v9 = vadd.f32 %v1780_v34, %v559_v5  ;;  %v1514_v10 = vpop.f32.mrb[23].mxu1  ;;  %v826_v11 = vmax.f32 %v777_v0, 0.0 }
 0x122   :  { %v827_v12 = vmax.f32 %v778_v6, 0.0  ;;  %v853_v13 = vmax.f32 %v804_v9, 0.0 }
 0x124   :  { %v1275_v14 = vpack.c.bf16 %v827_v12, %v826_v11  ;;  %v1340_v15 = vpack.c.bf16 %v853_v13, %v852_v8 }
 0x125   :  { %v460_v16 = vpop.f32.mrb[24].mxu0  ;;  %v564_v17 = vpop.f32.mrb[24].mxu1 }
 0x126   :  { %1371 = vst [vmem:[%s1909_s3 + $0x28] sm:$0xff] %v1275_v14   ;;  %v779_v18 = vadd.f32 %v1780_v34, %v460_v16  ;;  %v1465_v19 = vpop.f32.mrb[25].mxu0  ;;  %1384 = vst [vmem:[%s1909_s3 + $0x90] sm:$0xff] %v1340_v15   ;;  %v805_v20 = vadd.f32 %v1780_v34, %v564_v17  ;;  %v1517_v21 = vpop.f32.mrb[25].mxu1 }
 0x127   :  { %v463_v22 = vpop.f32.mrb[26].mxu0  ;;  %v567_v23 = vpop.f32.mrb[26].mxu1 }
 0x128   :  { %v780_v24 = vadd.f32 %v1780_v34, %v463_v22  ;;  %v1466_v25 = vpop.f32.mrb[27].mxu0  ;;  %v854_v26 = vmax.f32 %v805_v20, 0.0  ;;  %v806_v27 = vadd.f32 %v1780_v34, %v567_v23  ;;  %v1518_v28 = vpop.f32.mrb[27].mxu1  ;;  %v828_v29 = vmax.f32 %v779_v18, 0.0 }
 0x12a   :  { %v829_v30 = vmax.f32 %v780_v24, 0.0  ;;  %v855_v31 = vmax.f32 %v806_v27, 0.0 }
 0x12c   :  { %v1280_v32 = vpack.c.bf16 %v829_v30, %v828_v29  ;;  %v1345_v33 = vpack.c.bf16 %v855_v31, %v854_v26 }
 0x12d   :  { %v468_v35 = vpop.f32.mrb[28].mxu0  ;;  %v572_v36 = vpop.f32.mrb[28].mxu1 }
 0x12e   :  { %1372 = vst [vmem:[%s1909_s3 + $0x30] sm:$0xff] %v1280_v32   ;;  %v781_v37 = vadd.f32 %v1780_v34, %v468_v35  ;;  %v1469_v38 = vpop.f32.mrb[29].mxu0  ;;  %1385 = vst [vmem:[%s1909_s3 + $0x98] sm:$0xff] %v1345_v33   ;;  %v807_v39 = vadd.f32 %v1780_v34, %v572_v36  ;;  %v1521_v40 = vpop.f32.mrb[29].mxu1 }
 0x12f   :  { %v471_v41 = vpop.f32.mrb[30].mxu0  ;;  %v575_v42 = vpop.f32.mrb[30].mxu1 }
 0x130   :  { %v782_v43 = vadd.f32 %v1780_v34, %v471_v41  ;;  %v1470_v44 = vpop.f32.mrb[31].mxu0  ;;  %v856_v45 = vmax.f32 %v807_v39, 0.0  ;;  %v808_v46 = vadd.f32 %v1780_v34, %v575_v42  ;;  %v1522_v47 = vpop.f32.mrb[31].mxu1  ;;  %v830_v48 = vmax.f32 %v781_v37, 0.0 }
 0x132   :  { %v831_v49 = vmax.f32 %v782_v43, 0.0  ;;  %v857_v50 = vmax.f32 %v808_v46, 0.0 }
 0x134   :  { %v1285_v51 = vpack.c.bf16 %v831_v49, %v830_v48  ;;  %v1350_v52 = vpack.c.bf16 %v857_v50, %v856_v45 }
 0x135   :  { %v476_v53 = vpop.f32.mrb[32].mxu0  ;;  %v580_v54 = vpop.f32.mrb[32].mxu1 }
 0x136   :  { %1373 = vst [vmem:[%s1909_s3 + $0x38] sm:$0xff] %v1285_v51   ;;  %v783_v55 = vadd.f32 %v1780_v34, %v476_v53  ;;  %v1473_v56 = vpop.f32.mrb[33].mxu0  ;;  %1386 = vst [vmem:[%s1909_s3 + $0xa0] sm:$0xff] %v1350_v52   ;;  %v809_v57 = vadd.f32 %v1780_v34, %v580_v54  ;;  %v1525_v58 = vpop.f32.mrb[33].mxu1 }
 0x137   :  { %v479_v59 = vpop.f32.mrb[34].mxu0  ;;  %v583_v60 = vpop.f32.mrb[34].mxu1 }
 0x138   :  { %v784_v61 = vadd.f32 %v1780_v34, %v479_v59  ;;  %v1474_v62 = vpop.f32.mrb[35].mxu0  ;;  %v858_v63 = vmax.f32 %v809_v57, 0.0  ;;  %v810_v0 = vadd.f32 %v1780_v34, %v583_v60  ;;  %v1526_v1 = vpop.f32.mrb[35].mxu1  ;;  %v832_v2 = vmax.f32 %v783_v55, 0.0 }
 0x13a   :  { %v833_v3 = vmax.f32 %v784_v61, 0.0  ;;  %v859_v4 = vmax.f32 %v810_v0, 0.0 }
 0x13c   :  { %v1290_v5 = vpack.c.bf16 %v833_v3, %v832_v2  ;;  %v1355_v6 = vpack.c.bf16 %v859_v4, %v858_v63 }
 0x13d   :  { %v484_v7 = vpop.f32.mrb[36].mxu0  ;;  %v588_v8 = vpop.f32.mrb[36].mxu1 }
 0x13e   :  { %1374 = vst [vmem:[%s1909_s3 + $0x40] sm:$0xff] %v1290_v5   ;;  %v785_v9 = vadd.f32 %v1780_v34, %v484_v7  ;;  %v1477_v10 = vpop.f32.mrb[37].mxu0  ;;  %1387 = vst [vmem:[%s1909_s3 + $0xa8] sm:$0xff] %v1355_v6   ;;  %v811_v11 = vadd.f32 %v1780_v34, %v588_v8  ;;  %v1529_v12 = vpop.f32.mrb[37].mxu1 }
 0x13f   :  { %v487_v13 = vpop.f32.mrb[38].mxu0  ;;  %v591_v14 = vpop.f32.mrb[38].mxu1 }
 0x140   :  { %v786_v15 = vadd.f32 %v1780_v34, %v487_v13  ;;  %v1478_v16 = vpop.f32.mrb[39].mxu0  ;;  %v860_v17 = vmax.f32 %v811_v11, 0.0  ;;  %v812_v18 = vadd.f32 %v1780_v34, %v591_v14  ;;  %v1530_v19 = vpop.f32.mrb[39].mxu1  ;;  %v834_v20 = vmax.f32 %v785_v9, 0.0 }
 0x142   :  { %v835_v21 = vmax.f32 %v786_v15, 0.0  ;;  %v861_v22 = vmax.f32 %v812_v18, 0.0 }
 0x144   :  { %v1295_v23 = vpack.c.bf16 %v835_v21, %v834_v20  ;;  %v1360_v24 = vpack.c.bf16 %v861_v22, %v860_v17 }
 0x145   :  { %v492_v25 = vpop.f32.mrb[40].mxu0  ;;  %v596_v26 = vpop.f32.mrb[40].mxu1 }
 0x146   :  { %1375 = vst [vmem:[%s1909_s3 + $0x48] sm:$0xff] %v1295_v23   ;;  %v787_v27 = vadd.f32 %v1780_v34, %v492_v25  ;;  %v1481_v28 = vpop.f32.mrb[41].mxu0  ;;  %1388 = vst [vmem:[%s1909_s3 + $0xb0] sm:$0xff] %v1360_v24   ;;  %v813_v29 = vadd.f32 %v1780_v34, %v596_v26  ;;  %v1533_v30 = vpop.f32.mrb[41].mxu1 }
 0x147   :  { %v495_v31 = vpop.f32.mrb[42].mxu0  ;;  %v599_v32 = vpop.f32.mrb[42].mxu1 }
 0x148   :  { %v788_v33 = vadd.f32 %v1780_v34, %v495_v31  ;;  %v1482_v35 = vpop.f32.mrb[43].mxu0  ;;  %v862_v36 = vmax.f32 %v813_v29, 0.0  ;;  %v814_v37 = vadd.f32 %v1780_v34, %v599_v32  ;;  %v1534_v38 = vpop.f32.mrb[43].mxu1  ;;  %v836_v39 = vmax.f32 %v787_v27, 0.0 }
 0x14a   :  { %v837_v40 = vmax.f32 %v788_v33, 0.0  ;;  %v863_v41 = vmax.f32 %v814_v37, 0.0 }
 0x14c   :  { %v1300_v42 = vpack.c.bf16 %v837_v40, %v836_v39  ;;  %v1365_v43 = vpack.c.bf16 %v863_v41, %v862_v36 }
 0x14d   :  { %v500_v44 = vpop.f32.mrb[44].mxu0  ;;  %v604_v45 = vpop.f32.mrb[44].mxu1 }
 0x14e   :  { %1376 = vst [vmem:[%s1909_s3 + $0x50] sm:$0xff] %v1300_v42   ;;  %v789_v46 = vadd.f32 %v1780_v34, %v500_v44  ;;  %v1485_v47 = vpop.f32.mrb[45].mxu0  ;;  %1389 = vst [vmem:[%s1909_s3 + $0xb8] sm:$0xff] %v1365_v43   ;;  %v815_v48 = vadd.f32 %v1780_v34, %v604_v45  ;;  %v1537_v49 = vpop.f32.mrb[45].mxu1 }
 0x14f   :  { %v503_v50 = vpop.f32.mrb[46].mxu0  ;;  %v607_v51 = vpop.f32.mrb[46].mxu1 }
 0x150   :  { %v790_v52 = vadd.f32 %v1780_v34, %v503_v50  ;;  %v1486_v53 = vpop.f32.mrb[47].mxu0  ;;  %v864_v54 = vmax.f32 %v815_v48, 0.0  ;;  %v1538_v55 = vpop.f32.mrb[47].mxu1  ;;  %v838_v56 = vmax.f32 %v789_v46, 0.0 }
 0x152   :  { %v839_v57 = vmax.f32 %v790_v52, 0.0  ;;  %v1246_v58 = vpack.c.bf16 %v864_v54, %v864_v54 }
 0x154   :  { %v1305_v59 = vpack.c.bf16 %v839_v57, %v838_v56  ;;  %1110 = vst [vmem:[%s1909_s3 + $0xc0] sm:$0xf] %v1246_v58 }
 0x155   :  { %v508_v60 = vpop.f32.mrb[48].mxu0 }
 0x156   :  { %1377 = vst [vmem:[%s1909_s3 + $0x58] sm:$0xff] %v1305_v59   ;;  %v791_v61 = vadd.f32 %v1780_v34, %v508_v60  ;;  %v1489_v62 = vpop.f32.mrb[49].mxu0 }
 0x157   :  { %v511_v63 = vpop.f32.mrb[50].mxu0 }
 0x158   :  { %v792_v0 = vadd.f32 %v1780_v34, %v511_v63  ;;  %v1490_v1 = vpop.f32.mrb[51].mxu0  ;;  %v840_v2 = vmax.f32 %v791_v61, 0.0 }
 0x15a   :  { %v841_v3 = vmax.f32 %v792_v0, 0.0 }
 0x15c   :  { %v1310_v4 = vpack.c.bf16 %v841_v3, %v840_v2 }
 0x15e   :  { %1378 = vst [vmem:[%s1909_s3 + $0x60] sm:$0xff] %v1310_v4  }

// kernel: cnn_to_rnn_forward.10
= control target key start
LH: loop header
LB: loop body
LE: loop exit
PB: predicated region body
PF: predicated region fallthrough
CT: control target
= control target key end

     0   :  { %s754_s9 = smov 0   ;;  %s756_s10 = smov 0   ;;  %s892_s0 = inlined_call_operand.vmem [shape: f32[9,8,512], index: 0, kind: input, shape index: {}]   ;;  %s893_s1 = inlined_call_operand.vmem [shape: bf16[128,512], index: 1, kind: input, shape index: {}]   ;;  %s894_s2 = inlined_call_operand.vmem [shape: bf16[9,8,128], index: 2, kind: output, shape index: {}]  }
   0x1   :  { %s758_s11 = smov 0  }
   0x2 LB: > { %s21_s12 = sadd.s32 1, %s731_s10  ;;  %p580_p0 = scmp.ge.s32.totalorder %s735_s11, 1  ;;  %s735_s11 = sphi %s758_s11, %s12_s11   ;;  %s731_s10 = sphi %s756_s10, %s896_s10   ;;  %s727_s9 = sphi %s754_s9, %s895_s9  }
   0x3   : > { %p22_p1 = scmp.ge.s32.totalorder %s21_s12, 9  ;;  %p132_p2 = scmp.lt.s32.totalorder %s735_s11, 10 }
   0x5   : > { %s898_s12 = smov (%p22_p1, %s21_s12), 0  ;;  %p133_p3 = pnand %p580_p0, %p132_p2 }
   0x6   : > { %p160_p4 = scmp.lt.s32.totalorder (!%p133_p3), %s727_s9, 8  ;;  %p584_p5 = scmp.ne.s32.totalorder (!%p133_p3), %s727_s9, 0 }
   0x7   : > { %136 = sbr.rel (%p133_p3) target bundleno = 317 (0x13d), region = 28 }
   0xe   : > { %s161_s13 = scalar_select %p160_p4, %s727_s9, 8 }
   0xf   : > { %180 = sbr.rel (%p584_p5) target bundleno = 22 (0x16), region = 32  ;;  %v737_v0 = vmov (!%p584_p5), 0.0  }
  0x10   : > { %s622_s14 = sshll.u32 %s161_s13, 5  ;;  %s583_s15 = sshll.u32 %s161_s13, 2  ;;  %181 = vst [vmem:[#allocation2] sm:$0xff] (!%p584_p5), %v737_v0  ;;  %182 = vst [vmem:[#allocation3] sm:$0xff] (!%p584_p5), %v737_v0 }
  0x11   : > { %s775_s18 = scalar_lea.vmem %s892_s0, %s622_s14  ;;  %s780_s21 = scalar_lea.vmem %s894_s2, %s583_s15 }
  0x16 PF: > { %v649_v1 = vld [vmem:[%s893_s1 + $0x4] ss:$16 sps:$4 sm:$0xff]   ;;  %v651_v2 = vld [vmem:[%s893_s1] ss:$16 sps:$4 sm:$0xff]   ;;  %v738_v3 = vmov 0   ;;  %v184_v37 = vld [vmem:[%s775_s18 + $0x8] sm:$0xff] }
  0x17   : > { %413 = vmatprep.mubr.bf16.mxu0 %v738_v3  ;;  %454 = vmatprep.mubr.bf16.mxu1 %v738_v3  ;;  %v652_v4 = vld [vmem:[%s893_s1 + $0x24] ss:$16 sps:$4 sm:$0xff]   ;;  %v654_v5 = vld [vmem:[%s893_s1 + $0x20] ss:$16 sps:$4 sm:$0xff]   ;;  %v660_v7 = vld [vmem:[%s893_s1 + $0xc] ss:$16 sps:$4 sm:$0xff]  }
  0x18   : > { %381 = vmatprep.subr.bf16.mxu0 %v649_v1  ;;  %v655_v6 = vld [vmem:[%s893_s1 + $0x44] ss:$16 sps:$4 sm:$0xff]   ;;  %v663_v8 = vld [vmem:[%s893_s1 + $0x8] ss:$16 sps:$4 sm:$0xff]   ;;  %v657_v9 = vld [vmem:[%s893_s1 + $0x40] ss:$16 sps:$4 sm:$0xff]   ;;  %422 = vmatprep.subr.bf16.mxu1 %v660_v7 }
  0x19   : > { %382 = vmatpush1.bf16.msra.mxu0 %v651_v2  ;;  %v658_v10 = vld [vmem:[%s893_s1 + $0x64] ss:$16 sps:$4 sm:$0xff]   ;;  %423 = vmatpush1.bf16.msra.mxu1 %v663_v8  ;;  %v666_v11 = vld [vmem:[%s893_s1 + $0x2c] ss:$16 sps:$4 sm:$0xff]   ;;  %v669_v12 = vld [vmem:[%s893_s1 + $0x28] ss:$16 sps:$4 sm:$0xff]  }
  0x1a   : > { %383 = vmatprep.subr.bf16.mxu0 %v652_v4  ;;  %424 = vmatprep.subr.bf16.mxu1 %v666_v11  ;;  %v662_v13 = vld [vmem:[%s893_s1 + $0x60] ss:$16 sps:$4 sm:$0xff]   ;;  %v664_v14 = vld [vmem:[%s893_s1 + $0x84] ss:$16 sps:$4 sm:$0xff]   ;;  %v672_v15 = vld [vmem:[%s893_s1 + $0x4c] ss:$16 sps:$4 sm:$0xff]  }
  0x1b   : > { %v675_v16 = vld [vmem:[%s893_s1 + $0x48] ss:$16 sps:$4 sm:$0xff]   ;;  %v678_v17 = vld [vmem:[%s893_s1 + $0x6c] ss:$16 sps:$4 sm:$0xff]   ;;  %v668_v18 = vld [vmem:[%s893_s1 + $0x80] ss:$16 sps:$4 sm:$0xff]  }
  0x1c   : > { %v670_v19 = vld [vmem:[%s893_s1 + $0xa4] ss:$16 sps:$4 sm:$0xff]   ;;  %v681_v20 = vld [vmem:[%s893_s1 + $0x68] ss:$16 sps:$4 sm:$0xff]   ;;  %v684_v21 = vld [vmem:[%s893_s1 + $0x8c] ss:$16 sps:$4 sm:$0xff]  }
  0x1d   : > { %384 = vmatpush1.bf16.msra.mxu0 %v654_v5  ;;  %425 = vmatpush1.bf16.msra.mxu1 %v669_v12  ;;  %v674_v22 = vld [vmem:[%s893_s1 + $0xa0] ss:$16 sps:$4 sm:$0xff]   ;;  %v676_v23 = vld [vmem:[%s893_s1 + $0xc4] ss:$16 sps:$4 sm:$0xff]   ;;  %v687_v24 = vld [vmem:[%s893_s1 + $0x88] ss:$16 sps:$4 sm:$0xff]  }
  0x1e   : > { %385 = vmatprep.subr.bf16.mxu0 %v655_v6  ;;  %426 = vmatprep.subr.bf16.mxu1 %v672_v15  ;;  %v688_v25 = vld [vmem:[%s893_s1 + $0xac] ss:$16 sps:$4 sm:$0xff]   ;;  %v680_v26 = vld [vmem:[%s893_s1 + $0xc0] ss:$16 sps:$4 sm:$0xff]   ;;  %v682_v27 = vld [vmem:[%s893_s1 + $0xe4] ss:$16 sps:$4 sm:$0xff]  }
  0x1f   : > { %v690_v28 = vld [vmem:[%s893_s1 + $0xa8] ss:$16 sps:$4 sm:$0xff]   ;;  %v691_v29 = vld [vmem:[%s893_s1 + $0xcc] ss:$16 sps:$4 sm:$0xff]   ;;  %v686_v30 = vld [vmem:[%s893_s1 + $0xe0] ss:$16 sps:$4 sm:$0xff]  }
  0x20   : > { %v187_v31 = vld [vmem:[#allocation2] sm:$0xff]  ;;  %v693_v32 = vld [vmem:[%s893_s1 + $0xc8] ss:$16 sps:$4 sm:$0xff]   ;;  %v694_v33 = vld [vmem:[%s893_s1 + $0xec] ss:$16 sps:$4 sm:$0xff]  }
  0x21   : > { %386 = vmatpush1.bf16.msra.mxu0 %v657_v9  ;;  %427 = vmatpush1.bf16.msra.mxu1 %v675_v16  ;;  %v188_v34 = vpack.c.bf16 %v187_v31, %v187_v31  ;;  %v696_v35 = vld [vmem:[%s893_s1 + $0xe8] ss:$16 sps:$4 sm:$0xff]   ;;  %v183_v36 = vld [vmem:[%s775_s18] sm:$0xff]  ;;  %v185_v52 = vld [vmem:[%s775_s18 + $0x10] sm:$0xff] }
  0x22   : > { %387 = vmatprep.subr.bf16.mxu0 %v658_v10  ;;  %428 = vmatprep.subr.bf16.mxu1 %v678_v17  ;;  %v186_v46 = vld [vmem:[%s775_s18 + $0x18] sm:$0xff]  ;;  %v486_v61 = vld [vmem:[#allocation3] sm:$0xff] }
  0x25   : > { %388 = vmatpush1.bf16.msra.mxu0 %v662_v13  ;;  %429 = vmatpush1.bf16.msra.mxu1 %v681_v20 }
  0x26   : > { %389 = vmatprep.subr.bf16.mxu0 %v664_v14  ;;  %430 = vmatprep.subr.bf16.mxu1 %v684_v21 }
  0x29   : > { %390 = vmatpush1.bf16.msra.mxu0 %v668_v18  ;;  %431 = vmatpush1.bf16.msra.mxu1 %v687_v24 }
  0x2a   : > { %391 = vmatprep.subr.bf16.mxu0 %v670_v19  ;;  %432 = vmatprep.subr.bf16.mxu1 %v688_v25 }
  0x2d   : > { %392 = vmatpush1.bf16.msra.mxu0 %v674_v22  ;;  %433 = vmatpush1.bf16.msra.mxu1 %v690_v28 }
  0x2e   : > { %393 = vmatprep.subr.bf16.mxu0 %v676_v23  ;;  %434 = vmatprep.subr.bf16.mxu1 %v691_v29 }
  0x31   : > { %394 = vmatpush1.bf16.msra.mxu0 %v680_v26  ;;  %435 = vmatpush1.bf16.msra.mxu1 %v693_v32 }
  0x32   : > { %395 = vmatprep.subr.bf16.mxu0 %v682_v27  ;;  %436 = vmatprep.subr.bf16.mxu1 %v694_v33 }
  0x35   : > { %396 = vmatpush1.bf16.msra.mxu0 %v686_v30  ;;  %437 = vmatpush1.bf16.msra.mxu1 %v696_v35 }
  0x38   : > { %414 = vmatmul.mubr.bf16.vlgmr.msra.gmra.mrb[0].mxu0 %v188_v34  ;;  %455 = vmatmul.mubr.bf16.vlgmr.msra.gmra.mrb[0].mxu1 %v188_v34 }
 0x10b   : > { %v415_v38 = vpop.f32.mrb[0].mxu0  ;;  %v456_v47 = vpop.f32.mrb[0].mxu1 }
 0x10c   : > { %v463_v39 = vadd.f32 %v415_v38, %v183_v36  ;;  %v417_v40 = vpop.f32.mrb[1].mxu0  ;;  %v458_v48 = vpop.f32.mrb[1].mxu1  ;;  %v465_v54 = vadd.f32 %v456_v47, %v185_v52 }
 0x10d   : > { %v464_v41 = vadd.f32 %v417_v40, %v184_v37  ;;  %v419_v42 = vpop.f32.mrb[2].mxu0  ;;  %v466_v49 = vadd.f32 %v458_v48, %v186_v46  ;;  %v460_v50 = vpop.f32.mrb[2].mxu1 }
 0x10e   : > { %v617_v43 = vmul.f32 -1.442695, %v463_v39  ;;  %v420_v44 = vpop.f32.mrb[3].mxu0  ;;  %v461_v51 = vpop.f32.mrb[3].mxu1 }
 0x10f   : > { %v618_v45 = vmul.f32 -1.442695, %v464_v41  ;;  %v619_v53 = vmul.f32 -1.442695, %v466_v49 }
 0x110   : > { %697 = vpow2.f32 %v617_v43 }
 0x111   : > { %699 = vpow2.f32 %v618_v45 }
 0x112   : > { %701 = vpow2.f32 %v619_v53 }
 0x113   : > { %703 = vtanh.f32 %v465_v54 }
 0x11a   : > { %v698_v55 = vpop.eup %697 }
 0x11b   : > { %v700_v56 = vpop.eup %699  ;;  %v470_v57 = vadd.f32 1.0, %v698_v55 }
 0x11c   : > { %v476_v58 = vadd.f32 1.0, %v700_v56  ;;  %v702_v59 = vpop.eup %701 }
 0x11d   : > { %705 = vrcp.f32 %v470_v57  ;;  %v704_v60 = vpop.eup %703  ;;  %v483_v63 = vadd.f32 1.0, %v702_v59 }
 0x11e   : > { %707 = vrcp.f32 %v476_v58 }
 0x11f   : > { %709 = vrcp.f32 %v483_v63 }
 0x127   : > { %v706_v62 = vpop.eup %705 }
 0x128   : > { %v708_v0 = vpop.eup %707  ;;  %v488_v1 = vmul.f32 %v706_v62, %v704_v60 }
 0x129   : > { %v487_v2 = vmul.f32 %v708_v0, %v486_v61  ;;  %v710_v4 = vpop.eup %709 }
 0x12b   : > { %v489_v3 = vadd.f32 %v488_v1, %v487_v2 }
 0x12d   : > { %711 = vtanh.f32 %v489_v3  ;;  %492 = vst [vmem:[#allocation3] sm:$0xff] %v489_v3 }
 0x137   : > { %v712_v5 = vpop.eup %711 }
 0x138   : > { %v491_v6 = vmul.f32 %v712_v5, %v710_v4 }
 0x13a   : > { %493 = vst [vmem:[#allocation2] sm:$0xff] %v491_v6  ;;  %v494_v7 = vpack.c.bf16 %v491_v6, %v491_v6 }
 0x13c   : > { %495 = vst [vmem:[%s780_s21] sm:$0xf] %v494_v7 }
 0x13d PF: > { %s12_s11 = sadd.s32 1, %s735_s11   ;;  %s895_s9 = smov %s731_s10 }
 0x13e   : > { %p9_p6 = scmp.ge.s32.totalorder %s12_s11, 11   ;;  %s896_s10 = smov %s898_s12 }
 0x140   :  { %11 = sbr.rel (!%p9_p6) target bundleno = 2 (0x2), region = 62 }

// kernel: cnn_to_rnn_forward.9
= control target key start
LH: loop header
LB: loop body
LE: loop exit
PB: predicated region body
PF: predicated region fallthrough
CT: control target
= control target key end

     0   :  { %v783_v1 = vmov 0   ;;  %v595_v38 = vlaneseq  ;;  %s1080_s1 = inlined_call_operand.vmem [shape: bf16[128,512], index: 1, kind: input, shape index: {}]   ;;  %s1081_s0 = inlined_call_operand.vmem [shape: bf16[72,128], index: 0, kind: input, shape index: {}]   ;;  %s1082_s2 = inlined_call_operand.vmem [shape: f32[1,512], index: 2, kind: input, shape index: {}]   ;;  %s1083_s3 = inlined_call_operand.vmem [shape: f32[72,512], index: 3, kind: output, shape index: {}]  }
   0x1   :  { %v730_v0 = vld [vmem:[%s1080_s1 + $0x4] ss:$16 sps:$4 sm:$0xff]   ;;  %352 = vmatprep.mubr.bf16.mxu0 %v783_v1  ;;  %433 = vmatprep.mubr.bf16.mxu1 %v783_v1  ;;  %v732_v2 = vld [vmem:[%s1080_s1 + $0xc] ss:$16 sps:$4 sm:$0xff]   ;;  %v734_v3 = vld [vmem:[%s1080_s1] ss:$16 sps:$4 sm:$0xff]  }
   0x2   :  { %320 = vmatprep.subr.bf16.mxu0 %v730_v0  ;;  %v735_v4 = vld [vmem:[%s1080_s1 + $0x8] ss:$16 sps:$4 sm:$0xff]   ;;  %401 = vmatprep.subr.bf16.mxu1 %v732_v2  ;;  %v736_v5 = vld [vmem:[%s1080_s1 + $0x24] ss:$16 sps:$4 sm:$0xff]   ;;  %v738_v6 = vld [vmem:[%s1080_s1 + $0x2c] ss:$16 sps:$4 sm:$0xff]  }
   0x3   :  { %321 = vmatpush1.bf16.msra.mxu0 %v734_v3  ;;  %402 = vmatpush1.bf16.msra.mxu1 %v735_v4  ;;  %v740_v7 = vld [vmem:[%s1080_s1 + $0x20] ss:$16 sps:$4 sm:$0xff]   ;;  %v741_v8 = vld [vmem:[%s1080_s1 + $0x28] ss:$16 sps:$4 sm:$0xff]   ;;  %v742_v9 = vld [vmem:[%s1080_s1 + $0x44] ss:$16 sps:$4 sm:$0xff]  }
   0x4   :  { %322 = vmatprep.subr.bf16.mxu0 %v736_v5  ;;  %403 = vmatprep.subr.bf16.mxu1 %v738_v6  ;;  %v744_v10 = vld [vmem:[%s1080_s1 + $0x4c] ss:$16 sps:$4 sm:$0xff]   ;;  %v746_v11 = vld [vmem:[%s1080_s1 + $0x40] ss:$16 sps:$4 sm:$0xff]   ;;  %v747_v12 = vld [vmem:[%s1080_s1 + $0x48] ss:$16 sps:$4 sm:$0xff]  }
   0x5   :  { %v748_v13 = vld [vmem:[%s1080_s1 + $0x64] ss:$16 sps:$4 sm:$0xff]   ;;  %v750_v14 = vld [vmem:[%s1080_s1 + $0x6c] ss:$16 sps:$4 sm:$0xff]   ;;  %v752_v15 = vld [vmem:[%s1080_s1 + $0x60] ss:$16 sps:$4 sm:$0xff]  }
   0x6   :  { %v753_v16 = vld [vmem:[%s1080_s1 + $0x68] ss:$16 sps:$4 sm:$0xff]   ;;  %v754_v17 = vld [vmem:[%s1080_s1 + $0x84] ss:$16 sps:$4 sm:$0xff]   ;;  %v756_v18 = vld [vmem:[%s1080_s1 + $0x8c] ss:$16 sps:$4 sm:$0xff]  }
   0x7   :  { %323 = vmatpush1.bf16.msra.mxu0 %v740_v7  ;;  %404 = vmatpush1.bf16.msra.mxu1 %v741_v8  ;;  %v758_v19 = vld [vmem:[%s1080_s1 + $0x80] ss:$16 sps:$4 sm:$0xff]   ;;  %v759_v20 = vld [vmem:[%s1080_s1 + $0x88] ss:$16 sps:$4 sm:$0xff]   ;;  %v760_v21 = vld [vmem:[%s1080_s1 + $0xa4] ss:$16 sps:$4 sm:$0xff]  }
   0x8   :  { %324 = vmatprep.subr.bf16.mxu0 %v742_v9  ;;  %405 = vmatprep.subr.bf16.mxu1 %v744_v10  ;;  %v762_v22 = vld [vmem:[%s1080_s1 + $0xac] ss:$16 sps:$4 sm:$0xff]   ;;  %v764_v23 = vld [vmem:[%s1080_s1 + $0xa0] ss:$16 sps:$4 sm:$0xff]   ;;  %v765_v24 = vld [vmem:[%s1080_s1 + $0xa8] ss:$16 sps:$4 sm:$0xff]  }
   0x9   :  { %v766_v25 = vld [vmem:[%s1080_s1 + $0xc4] ss:$16 sps:$4 sm:$0xff]   ;;  %v768_v26 = vld [vmem:[%s1080_s1 + $0xcc] ss:$16 sps:$4 sm:$0xff]   ;;  %v770_v27 = vld [vmem:[%s1080_s1 + $0xc0] ss:$16 sps:$4 sm:$0xff]  }
   0xa   :  { %v771_v28 = vld [vmem:[%s1080_s1 + $0xc8] ss:$16 sps:$4 sm:$0xff]   ;;  %v772_v29 = vld [vmem:[%s1080_s1 + $0xe4] ss:$16 sps:$4 sm:$0xff]   ;;  %v774_v30 = vld [vmem:[%s1080_s1 + $0xec] ss:$16 sps:$4 sm:$0xff]  }
   0xb   :  { %325 = vmatpush1.bf16.msra.mxu0 %v746_v11  ;;  %406 = vmatpush1.bf16.msra.mxu1 %v747_v12  ;;  %v776_v31 = vld [vmem:[%s1080_s1 + $0xe0] ss:$16 sps:$4 sm:$0xff]   ;;  %v777_v32 = vld [vmem:[%s1080_s1 + $0xe8] ss:$16 sps:$4 sm:$0xff]   ;;  %v596_v39 = vshrl.u32 %v595_v38, 7 }
   0xc   :  { %326 = vmatprep.subr.bf16.mxu0 %v748_v13  ;;  %407 = vmatprep.subr.bf16.mxu1 %v750_v14  ;;  %v778_v33 = vld [vmem:[%s1081_s0] sm:$0xff]   ;;  %v779_v34 = vld [vmem:[%s1081_s0 + $0x8] sm:$0xff]   ;;  %v780_v35 = vld [vmem:[%s1081_s0 + $0x10] sm:$0xff]  }
   0xd   :  { %v781_v36 = vld [vmem:[%s1081_s0 + $0x18] sm:$0xff]   ;;  %v782_v37 = vld [vmem:[%s1081_s0 + $0x20] ss:$0 sps:$4 sm:$0xff]   ;;  %v597_v40 = vsub.s32 0, %v596_v39  ;;  %v605_v41 = vsub.s32 2, %v596_v39  ;;  %v601_v43 = vsub.s32 1, %v596_v39 }
   0xe   :  { %v593_v42 = vld [vmem:[%s1082_s2] sm:$0xf]  ;;  %v609_v44 = vsub.s32 3, %v596_v39 }
   0xf   :  { %327 = vmatpush1.bf16.msra.mxu0 %v752_v15  ;;  %408 = vmatpush1.bf16.msra.mxu1 %v753_v16  ;;  %v928_v45 = vrot.slane %v593_v42, %v597_v40  ;;  %v930_v46 = vrot.slane %v593_v42, %v605_v41  ;;  %v932_v49 = vrot.slane %v593_v42, %v601_v43 }
  0x10   :  { %328 = vmatprep.subr.bf16.mxu0 %v754_v17  ;;  %409 = vmatprep.subr.bf16.mxu1 %v756_v18  ;;  %v934_v50 = vrot.slane %v593_v42, %v609_v44 }
  0x13   :  { %329 = vmatpush1.bf16.msra.mxu0 %v758_v19  ;;  %410 = vmatpush1.bf16.msra.mxu1 %v759_v20 }
  0x14   :  { %330 = vmatprep.subr.bf16.mxu0 %v760_v21  ;;  %411 = vmatprep.subr.bf16.mxu1 %v762_v22 }
  0x17   :  { %331 = vmatpush1.bf16.msra.mxu0 %v764_v23  ;;  %412 = vmatpush1.bf16.msra.mxu1 %v765_v24 }
  0x18   :  { %332 = vmatprep.subr.bf16.mxu0 %v766_v25  ;;  %413 = vmatprep.subr.bf16.mxu1 %v768_v26 }
  0x1b   :  { %333 = vmatpush1.bf16.msra.mxu0 %v770_v27  ;;  %414 = vmatpush1.bf16.msra.mxu1 %v771_v28 }
  0x1c   :  { %334 = vmatprep.subr.bf16.mxu0 %v772_v29  ;;  %415 = vmatprep.subr.bf16.mxu1 %v774_v30 }
  0x1f   :  { %335 = vmatpush1.bf16.msra.mxu0 %v776_v31  ;;  %416 = vmatpush1.bf16.msra.mxu1 %v777_v32 }
  0x22   :  { %353 = vmatmul.mubr.bf16.vlgmr.msra.gmra.mrb[0].mxu0 %v778_v33  ;;  %434 = vmatmul.mubr.bf16.vlgmr.msra.gmra.mrb[0].mxu1 %v778_v33 }
  0x23   :  { %362 = vmatprep.mubr.bf16.mxu0 %v783_v1  ;;  %443 = vmatprep.mubr.bf16.mxu1 %v783_v1 }
  0x2a   :  { %363 = vmatmul.mubr.bf16.gmra.mrb[4].mxu0 %v779_v34  ;;  %444 = vmatmul.mubr.bf16.gmra.mrb[4].mxu1 %v779_v34 }
  0x2b   :  { %372 = vmatprep.mubr.bf16.mxu0 %v783_v1  ;;  %453 = vmatprep.mubr.bf16.mxu1 %v783_v1 }
  0x32   :  { %373 = vmatmul.mubr.bf16.gmra.mrb[8].mxu0 %v780_v35  ;;  %454 = vmatmul.mubr.bf16.gmra.mrb[8].mxu1 %v780_v35 }
  0x33   :  { %382 = vmatprep.mubr.bf16.mxu0 %v783_v1  ;;  %463 = vmatprep.mubr.bf16.mxu1 %v783_v1 }
  0x3a   :  { %383 = vmatmul.mubr.bf16.gmra.mrb[12].mxu0 %v781_v36  ;;  %464 = vmatmul.mubr.bf16.gmra.mrb[12].mxu1 %v781_v36 }
  0x3b   :  { %392 = vmatprep.mubr.bf16.mxu0 %v783_v1  ;;  %473 = vmatprep.mubr.bf16.mxu1 %v783_v1 }
  0x42   :  { %393 = vmatmul.mubr.bf16.gmra.mrb[16].mxu0 %v782_v37  ;;  %474 = vmatmul.mubr.bf16.gmra.mrb[16].mxu1 %v782_v37 }
  0xf5   :  { %v354_v47 = vpop.f32.mrb[0].mxu0  ;;  %v435_v48 = vpop.f32.mrb[0].mxu1 }
  0xf6   :  { %v356_v51 = vpop.f32.mrb[1].mxu0  ;;  %v437_v52 = vpop.f32.mrb[1].mxu1  ;;  %v615_v55 = vadd.f32 %v928_v45, %v354_v47  ;;  %v617_v56 = vadd.f32 %v930_v46, %v435_v48 }
  0xf7   :  { %v358_v53 = vpop.f32.mrb[2].mxu0  ;;  %v439_v54 = vpop.f32.mrb[2].mxu1  ;;  %v616_v59 = vadd.f32 %v932_v49, %v356_v51  ;;  %v618_v60 = vadd.f32 %v934_v50, %v437_v52 }
  0xf8   :  { %v360_v57 = vpop.f32.mrb[3].mxu0  ;;  %v441_v58 = vpop.f32.mrb[3].mxu1  ;;  %651 = vst [vmem:[%s1083_s3] sm:$0xff] %v615_v55  ;;  %653 = vst [vmem:[%s1083_s3 + $0x10] sm:$0xff] %v617_v56  ;;  %v619_v61 = vadd.f32 %v928_v45, %v358_v53  ;;  %v621_v62 = vadd.f32 %v930_v46, %v439_v54 }
  0xf9   :  { %652 = vst [vmem:[%s1083_s3 + $0x8] sm:$0xff] %v616_v59  ;;  %654 = vst [vmem:[%s1083_s3 + $0x18] sm:$0xff] %v618_v60  ;;  %v620_v63 = vadd.f32 %v932_v49, %v360_v57  ;;  %v622_v0 = vadd.f32 %v934_v50, %v441_v58 }
  0xfa   :  { %655 = vst [vmem:[%s1083_s3 + $0x20] sm:$0xff] %v619_v61  ;;  %657 = vst [vmem:[%s1083_s3 + $0x30] sm:$0xff] %v621_v62 }
  0xfb   :  { %656 = vst [vmem:[%s1083_s3 + $0x28] sm:$0xff] %v620_v63  ;;  %658 = vst [vmem:[%s1083_s3 + $0x38] sm:$0xff] %v622_v0 }
  0xfd   :  { %v364_v1 = vpop.f32.mrb[4].mxu0  ;;  %v445_v2 = vpop.f32.mrb[4].mxu1 }
  0xfe   :  { %v366_v3 = vpop.f32.mrb[5].mxu0  ;;  %v447_v4 = vpop.f32.mrb[5].mxu1  ;;  %v623_v7 = vadd.f32 %v928_v45, %v364_v1  ;;  %v625_v8 = vadd.f32 %v930_v46, %v445_v2 }
  0xff   :  { %v368_v5 = vpop.f32.mrb[6].mxu0  ;;  %v449_v6 = vpop.f32.mrb[6].mxu1  ;;  %v624_v11 = vadd.f32 %v932_v49, %v366_v3  ;;  %v626_v12 = vadd.f32 %v934_v50, %v447_v4 }
 0x100   :  { %v370_v9 = vpop.f32.mrb[7].mxu0  ;;  %v451_v10 = vpop.f32.mrb[7].mxu1  ;;  %659 = vst [vmem:[%s1083_s3 + $0x40] sm:$0xff] %v623_v7  ;;  %661 = vst [vmem:[%s1083_s3 + $0x50] sm:$0xff] %v625_v8  ;;  %v627_v13 = vadd.f32 %v928_v45, %v368_v5  ;;  %v629_v14 = vadd.f32 %v930_v46, %v449_v6 }
 0x101   :  { %660 = vst [vmem:[%s1083_s3 + $0x48] sm:$0xff] %v624_v11  ;;  %662 = vst [vmem:[%s1083_s3 + $0x58] sm:$0xff] %v626_v12  ;;  %v628_v15 = vadd.f32 %v932_v49, %v370_v9  ;;  %v630_v16 = vadd.f32 %v934_v50, %v451_v10 }
 0x102   :  { %663 = vst [vmem:[%s1083_s3 + $0x60] sm:$0xff] %v627_v13  ;;  %665 = vst [vmem:[%s1083_s3 + $0x70] sm:$0xff] %v629_v14 }
 0x103   :  { %664 = vst [vmem:[%s1083_s3 + $0x68] sm:$0xff] %v628_v15  ;;  %666 = vst [vmem:[%s1083_s3 + $0x78] sm:$0xff] %v630_v16 }
 0x105   :  { %v374_v17 = vpop.f32.mrb[8].mxu0  ;;  %v455_v18 = vpop.f32.mrb[8].mxu1 }
 0x106   :  { %v376_v19 = vpop.f32.mrb[9].mxu0  ;;  %v457_v20 = vpop.f32.mrb[9].mxu1  ;;  %v631_v23 = vadd.f32 %v928_v45, %v374_v17  ;;  %v633_v24 = vadd.f32 %v930_v46, %v455_v18 }
 0x107   :  { %v378_v21 = vpop.f32.mrb[10].mxu0  ;;  %v459_v22 = vpop.f32.mrb[10].mxu1  ;;  %v632_v27 = vadd.f32 %v932_v49, %v376_v19  ;;  %v634_v28 = vadd.f32 %v934_v50, %v457_v20 }
 0x108   :  { %v380_v25 = vpop.f32.mrb[11].mxu0  ;;  %v461_v26 = vpop.f32.mrb[11].mxu1  ;;  %667 = vst [vmem:[%s1083_s3 + $0x80] sm:$0xff] %v631_v23  ;;  %669 = vst [vmem:[%s1083_s3 + $0x90] sm:$0xff] %v633_v24  ;;  %v635_v29 = vadd.f32 %v928_v45, %v378_v21  ;;  %v637_v30 = vadd.f32 %v930_v46, %v459_v22 }
 0x109   :  { %668 = vst [vmem:[%s1083_s3 + $0x88] sm:$0xff] %v632_v27  ;;  %670 = vst [vmem:[%s1083_s3 + $0x98] sm:$0xff] %v634_v28  ;;  %v636_v31 = vadd.f32 %v932_v49, %v380_v25  ;;  %v638_v32 = vadd.f32 %v934_v50, %v461_v26 }
 0x10a   :  { %671 = vst [vmem:[%s1083_s3 + $0xa0] sm:$0xff] %v635_v29  ;;  %673 = vst [vmem:[%s1083_s3 + $0xb0] sm:$0xff] %v637_v30 }
 0x10b   :  { %672 = vst [vmem:[%s1083_s3 + $0xa8] sm:$0xff] %v636_v31  ;;  %674 = vst [vmem:[%s1083_s3 + $0xb8] sm:$0xff] %v638_v32 }
 0x10d   :  { %v384_v33 = vpop.f32.mrb[12].mxu0  ;;  %v465_v34 = vpop.f32.mrb[12].mxu1 }
 0x10e   :  { %v386_v35 = vpop.f32.mrb[13].mxu0  ;;  %v467_v36 = vpop.f32.mrb[13].mxu1  ;;  %v639_v39 = vadd.f32 %v928_v45, %v384_v33  ;;  %v641_v40 = vadd.f32 %v930_v46, %v465_v34 }
 0x10f   :  { %v388_v37 = vpop.f32.mrb[14].mxu0  ;;  %v469_v38 = vpop.f32.mrb[14].mxu1  ;;  %v640_v43 = vadd.f32 %v932_v49, %v386_v35  ;;  %v642_v44 = vadd.f32 %v934_v50, %v467_v36 }
 0x110   :  { %v390_v41 = vpop.f32.mrb[15].mxu0  ;;  %v471_v42 = vpop.f32.mrb[15].mxu1  ;;  %675 = vst [vmem:[%s1083_s3 + $0xc0] sm:$0xff] %v639_v39  ;;  %677 = vst [vmem:[%s1083_s3 + $0xd0] sm:$0xff] %v641_v40  ;;  %v643_v47 = vadd.f32 %v928_v45, %v388_v37  ;;  %v645_v48 = vadd.f32 %v930_v46, %v469_v38 }
 0x111   :  { %676 = vst [vmem:[%s1083_s3 + $0xc8] sm:$0xff] %v640_v43  ;;  %678 = vst [vmem:[%s1083_s3 + $0xd8] sm:$0xff] %v642_v44  ;;  %v644_v51 = vadd.f32 %v932_v49, %v390_v41  ;;  %v646_v52 = vadd.f32 %v934_v50, %v471_v42 }
 0x112   :  { %679 = vst [vmem:[%s1083_s3 + $0xe0] sm:$0xff] %v643_v47  ;;  %681 = vst [vmem:[%s1083_s3 + $0xf0] sm:$0xff] %v645_v48 }
 0x113   :  { %680 = vst [vmem:[%s1083_s3 + $0xe8] sm:$0xff] %v644_v51  ;;  %682 = vst [vmem:[%s1083_s3 + $0xf8] sm:$0xff] %v646_v52 }
 0x115   :  { %v394_v53 = vpop.f32.mrb[16].mxu0  ;;  %v475_v54 = vpop.f32.mrb[16].mxu1 }
 0x116   :  { %v396_v55 = vpop.f32.mrb[17].mxu0  ;;  %v477_v56 = vpop.f32.mrb[17].mxu1  ;;  %v647_v59 = vadd.f32 %v928_v45, %v394_v53  ;;  %v649_v60 = vadd.f32 %v930_v46, %v475_v54 }
 0x117   :  { %v398_v57 = vpop.f32.mrb[18].mxu0  ;;  %v479_v58 = vpop.f32.mrb[18].mxu1  ;;  %v648_v63 = vadd.f32 %v932_v49, %v396_v55  ;;  %v650_v0 = vadd.f32 %v934_v50, %v477_v56 }
 0x118   :  { %v399_v61 = vpop.f32.mrb[19].mxu0  ;;  %v480_v62 = vpop.f32.mrb[19].mxu1  ;;  %683 = vst [vmem:[%s1083_s3 + $0x100] sm:$0xff] %v647_v59  ;;  %685 = vst [vmem:[%s1083_s3 + $0x110] sm:$0xff] %v649_v60 }
 0x119   :  { %684 = vst [vmem:[%s1083_s3 + $0x108] sm:$0xff] %v648_v63  ;;  %686 = vst [vmem:[%s1083_s3 + $0x118] sm:$0xff] %v650_v0 }

// kernel: cnn_to_rnn_forward.13
= control target key start
LH: loop header
LB: loop body
LE: loop exit
PB: predicated region body
PF: predicated region fallthrough
CT: control target
= control target key end

     0   :  { %v363_v0 = vmov 0.0   ;;  %vm364_vm0 = vmmov 0   ;;  %s459_s1 = inlined_call_operand.vmem [shape: bf16[128,128], index: 1, kind: input, shape index: {}]   ;;  %s460_s0 = inlined_call_operand.vmem [shape: bf16[72,128], index: 0, kind: input, shape index: {}]   ;;  %s461_s2 = inlined_call_operand.vmem [shape: f32[1,128], index: 2, kind: input, shape index: {}]   ;;  %s462_s3 = inlined_call_operand.vmem [shape: f32[72,128], index: 3, kind: output, shape index: {}]  }
   0x1   :  { %296 = vmatprep.subr.bf16.mxu0 %v363_v0  ;;  %v350_v1 = vld [vmem:[%s459_s1] sm:$0xff]   ;;  %332 = vmatprep.subr.bf16.mxu1 %v363_v0  ;;  %v351_v2 = vld [vmem:[%s459_s1 + $0x8] sm:$0xff]   ;;  %v352_v3 = vld [vmem:[%s459_s1 + $0x10] sm:$0xff]  }
   0x2   :  { %312 = vmatprep.mubr.msk.bf16.mxu0 %vm364_vm0, %v363_v0  ;;  %324 = vmatprep.mubr.msk.bf16.mxu1 %vm364_vm0, %v363_v0  ;;  %v353_v4 = vld [vmem:[%s459_s1 + $0x18] sm:$0xff]   ;;  %v354_v5 = vld [vmem:[%s459_s1 + $0x20] sm:$0xff]   ;;  %v355_v6 = vld [vmem:[%s459_s1 + $0x28] sm:$0xff]  }
   0x3   :  { %297 = vmatpush3.bf16.msra.mxu0 %v350_v1  ;;  %340 = vmatpush3.bf16.msra.mxu1 %v350_v1  ;;  %v356_v7 = vld [vmem:[%s459_s1 + $0x30] sm:$0xff]   ;;  %v357_v8 = vld [vmem:[%s459_s1 + $0x38] sm:$0xff]   ;;  %v358_v9 = vld [vmem:[%s460_s0] sm:$0xff]  }
   0x4   :  { %298 = vmatprep.subr.bf16.mxu0 %v363_v0  ;;  %333 = vmatprep.subr.bf16.mxu1 %v363_v0  ;;  %v359_v10 = vld [vmem:[%s460_s0 + $0x18] sm:$0xff]   ;;  %v360_v11 = vld [vmem:[%s460_s0 + $0x8] sm:$0xff]   ;;  %v361_v12 = vld [vmem:[%s460_s0 + $0x20] ss:$0 sps:$4 sm:$0xff]  }
   0x5   :  { %v362_v13 = vld [vmem:[%s460_s0 + $0x10] sm:$0xff]   ;;  %v282_v15 = vld [vmem:[%s461_s2] ss:$0 sm:$0xff] }
   0x7   :  { %299 = vmatpush3.bf16.msra.mxu0 %v351_v2  ;;  %341 = vmatpush3.bf16.msra.mxu1 %v351_v2 }
   0x8   :  { %300 = vmatprep.subr.bf16.mxu0 %v363_v0  ;;  %334 = vmatprep.subr.bf16.mxu1 %v363_v0 }
   0xb   :  { %301 = vmatpush3.bf16.msra.mxu0 %v352_v3  ;;  %342 = vmatpush3.bf16.msra.mxu1 %v352_v3 }
   0xc   :  { %302 = vmatprep.subr.bf16.mxu0 %v363_v0  ;;  %335 = vmatprep.subr.bf16.mxu1 %v363_v0 }
   0xf   :  { %303 = vmatpush3.bf16.msra.mxu0 %v353_v4  ;;  %343 = vmatpush3.bf16.msra.mxu1 %v353_v4 }
  0x10   :  { %304 = vmatprep.subr.bf16.mxu0 %v363_v0  ;;  %336 = vmatprep.subr.bf16.mxu1 %v363_v0 }
  0x13   :  { %305 = vmatpush3.bf16.msra.mxu0 %v354_v5  ;;  %344 = vmatpush3.bf16.msra.mxu1 %v354_v5 }
  0x14   :  { %306 = vmatprep.subr.bf16.mxu0 %v363_v0  ;;  %337 = vmatprep.subr.bf16.mxu1 %v363_v0 }
  0x17   :  { %307 = vmatpush3.bf16.msra.mxu0 %v355_v6  ;;  %345 = vmatpush3.bf16.msra.mxu1 %v355_v6 }
  0x18   :  { %308 = vmatprep.subr.bf16.mxu0 %v363_v0  ;;  %338 = vmatprep.subr.bf16.mxu1 %v363_v0 }
  0x1b   :  { %309 = vmatpush3.bf16.msra.mxu0 %v356_v7  ;;  %346 = vmatpush3.bf16.msra.mxu1 %v356_v7 }
  0x1c   :  { %310 = vmatprep.subr.bf16.mxu0 %v363_v0  ;;  %339 = vmatprep.subr.bf16.mxu1 %v363_v0 }
  0x1f   :  { %311 = vmatpush3.bf16.msra.mxu0 %v357_v8  ;;  %347 = vmatpush3.bf16.msra.mxu1 %v357_v8 }
  0x22   :  { %313 = vmatmul.mubr.bf16.vlgmr.msra.gmra.mrb[0].mxu0 %v358_v9  ;;  %325 = vmatmul.mubr.bf16.vlgmr.msra.gmra.mrb[0].mxu1 %v359_v10 }
  0x23   :  { %316 = vmatprep.mubr.msk.bf16.mxu0 %vm364_vm0, %v363_v0  ;;  %328 = vmatprep.mubr.msk.bf16.mxu1 %vm364_vm0, %v363_v0 }
  0x2a   :  { %317 = vmatmul.mubr.bf16.gmra.mrb[4].mxu0 %v360_v11  ;;  %329 = vmatmul.mubr.bf16.gmra.mrb[4].mxu1 %v361_v12 }
  0x2b   :  { %320 = vmatprep.mubr.msk.bf16.mxu0 %vm364_vm0, %v363_v0 }
  0x32   :  { %321 = vmatmul.mubr.bf16.gmra.mrb[8].mxu0 %v362_v13 }
  0xf5   :  { %v172_v14 = vpop.f32.mrb[0].mxu0  ;;  %v196_v16 = vpop.f32.mrb[0].mxu1 }
  0xf6   :  { %v314_v17 = vpop.f32.mrb[1].mxu0  ;;  %v326_v18 = vpop.f32.mrb[1].mxu1  ;;  %v247_v21 = vadd.f32 %v282_v15, %v172_v14  ;;  %v253_v23 = vadd.f32 %v282_v15, %v196_v16 }
  0xf7   :  { %v175_v19 = vpop.f32.mrb[2].mxu0  ;;  %v199_v20 = vpop.f32.mrb[2].mxu1 }
  0xf8   :  { %v315_v22 = vpop.f32.mrb[3].mxu0  ;;  %v327_v24 = vpop.f32.mrb[3].mxu1  ;;  %256 = vst [vmem:[%s462_s3] sm:$0xff] %v247_v21  ;;  %v248_v25 = vadd.f32 %v282_v15, %v175_v19  ;;  %262 = vst [vmem:[%s462_s3 + $0x30] sm:$0xff] %v253_v23  ;;  %v254_v26 = vadd.f32 %v282_v15, %v199_v20 }
  0xfa   :  { %257 = vst [vmem:[%s462_s3 + $0x8] sm:$0xff] %v248_v25  ;;  %263 = vst [vmem:[%s462_s3 + $0x38] sm:$0xff] %v254_v26 }
  0xfd   :  { %v180_v27 = vpop.f32.mrb[4].mxu0  ;;  %v204_v28 = vpop.f32.mrb[4].mxu1 }
  0xfe   :  { %v318_v29 = vpop.f32.mrb[5].mxu0  ;;  %v330_v30 = vpop.f32.mrb[5].mxu1  ;;  %v249_v33 = vadd.f32 %v282_v15, %v180_v27  ;;  %v255_v35 = vadd.f32 %v282_v15, %v204_v28 }
  0xff   :  { %v183_v31 = vpop.f32.mrb[6].mxu0  ;;  %v207_v32 = vpop.f32.mrb[6].mxu1 }
 0x100   :  { %v319_v34 = vpop.f32.mrb[7].mxu0  ;;  %v331_v36 = vpop.f32.mrb[7].mxu1  ;;  %258 = vst [vmem:[%s462_s3 + $0x10] sm:$0xff] %v249_v33  ;;  %v250_v37 = vadd.f32 %v282_v15, %v183_v31  ;;  %264 = vst [vmem:[%s462_s3 + $0x40] sm:$0xff] %v255_v35 }
 0x102   :  { %259 = vst [vmem:[%s462_s3 + $0x18] sm:$0xff] %v250_v37 }
 0x105   :  { %v188_v38 = vpop.f32.mrb[8].mxu0 }
 0x106   :  { %v322_v39 = vpop.f32.mrb[9].mxu0  ;;  %v251_v41 = vadd.f32 %v282_v15, %v188_v38 }
 0x107   :  { %v191_v40 = vpop.f32.mrb[10].mxu0 }
 0x108   :  { %v323_v42 = vpop.f32.mrb[11].mxu0  ;;  %260 = vst [vmem:[%s462_s3 + $0x20] sm:$0xff] %v251_v41  ;;  %v252_v43 = vadd.f32 %v282_v15, %v191_v40 }
 0x10a   :  { %261 = vst [vmem:[%s462_s3 + $0x28] sm:$0xff] %v252_v43 }

</bundles_post_ra>
